<compile_context>
chip_gen: v5e
topology: v5e:2x2
jax: 0.10.0
libtpu: 0.0.40
codegen_flags: <defaults>
</compile_context>

<pallas_src>
import functools

import jax
import jax.numpy as jnp
from jax import lax
from jax.experimental import pallas as pl
from jax.experimental.pallas import tpu as pltpu

INPUT_SIZE = 11
HIDDEN = 50
OUT_DIM = 4

HP = 128                 # per-gate / hidden-state lane padding (one lane tile)
MAX_TT = 512             # max timesteps folded into a single grid step
VMEM_ROW_BUDGET = 6144   # cap on TT*BB  (~24-26 MiB total VMEM incl. buffers)


def _round_up(v, m):
    return (v + m - 1) // m * m


def _sigmoid_via_tanh(z):
    # Exact logistic; single EUP push instead of exp + reciprocal.
    return 0.5 * jnp.tanh(0.5 * z) + 0.5


def _lstm_block_kernel(x_ref, wih_ref, whh_ref, bcat_ref, wlin_ref, blin_ref,
                       y_ref, h_ref, c_ref, pre_ref,
                       *, tt, bb, pre_chunk, proj_chunk, cdt):
    """One grid step == one (batch block, time block) of `tt` timesteps.

    x_ref    : (TT, BB, 128) f32  inputs, lanes 0..10 real, rest zero
    wih_ref  : (128, 512)    cdt  padded W_ih^T, each gate padded to 128 lanes
    whh_ref  : (128, 512)    cdt  padded W_hh^T
    bcat_ref : (1, 512)      f32  b_ih + b_hh, lane-padded with zeros
    wlin_ref : (128, 128)    cdt  padded W_linear^T
    blin_ref : (1, 128)      f32  padded b_linear
    y_ref    : (TT, BB, 128) f32  output block; holds h_t during the recurrence
    h_ref/c_ref : (BB, 128)  f32  recurrent state carried across time blocks
    pre_ref  : (TT, BB, 512) f32  precomputed x_t @ W_ih + b (per time block)
    """
    t_blk = pl.program_id(1)

    @pl.when(t_blk == 0)
    def _():
        h_ref[...] = jnp.zeros_like(h_ref)
        c_ref[...] = jnp.zeros_like(c_ref)

    # ---- Bulk input-to-hidden pre-gates (off the recurrence critical path) ----
    n_pre = tt // pre_chunk

    @pl.loop(0, n_pre)
    def _(j):
        s = pl.multiple_of(j * pre_chunk, pre_chunk)
        xs = x_ref[pl.ds(s, pre_chunk)]                       # (pre_chunk, BB, 128)
        lhs = xs.reshape(pre_chunk * bb, HP).astype(cdt)
        pg = jnp.dot(lhs, wih_ref[...],
                     preferred_element_type=jnp.float32) + bcat_ref[...]
        pre_ref[pl.ds(s, pre_chunk)] = pg.reshape(pre_chunk, bb, 4 * HP)

    # ---- Serial recurrence: per step only h @ W_hh goes through the MXU ----
    w_hh = whh_ref[...]                                       # hoisted (32 vregs bf16)

    def one_step(t, h, c):
        gates = pre_ref[t] + jnp.dot(h.astype(cdt), w_hh,
                                     preferred_element_type=jnp.float32)
        i_g = _sigmoid_via_tanh(gates[:, 0 * HP:1 * HP])
        f_g = _sigmoid_via_tanh(gates[:, 1 * HP:2 * HP])
        g_g = jnp.tanh(gates[:, 2 * HP:3 * HP])
        o_g = _sigmoid_via_tanh(gates[:, 3 * HP:4 * HP])
        c_new = f_g * c + i_g * g_g                           # padded lanes stay 0
        h_new = o_g * jnp.tanh(c_new)
        y_ref[t] = h_new                                      # stash h_t (lane-dense)
        return h_new, c_new

    def step2(i, carry):                                      # manual 2-way unroll
        h, c = carry
        t0 = pl.multiple_of(i * 2, 2)
        h, c = one_step(t0, h, c)
        h, c = one_step(t0 + 1, h, c)
        return h, c

    h_fin, c_fin = lax.fori_loop(0, tt // 2, step2, (h_ref[...], c_ref[...]))
    h_ref[...] = h_fin
    c_ref[...] = c_fin

    # ---- Bulk, lane-dense output projection: y_t = h_t @ W_lin^T + b_lin ----
    n_proj = tt // proj_chunk

    @pl.loop(0, n_proj)
    def _(j):
        s = pl.multiple_of(j * proj_chunk, proj_chunk)
        hs = y_ref[pl.ds(s, proj_chunk)]                      # (proj_chunk, BB, 128)
        lhs = hs.reshape(proj_chunk * bb, HP).astype(cdt)
        proj = jnp.dot(lhs, wlin_ref[...],
                       preferred_element_type=jnp.float32) + blin_ref[...]
        y_ref[pl.ds(s, proj_chunk)] = proj.reshape(proj_chunk, bb, HP)


def pack_params(params, compute_dtype=jnp.bfloat16):
    """Pack PyTorch-layout LSTM/Linear weights into lane-padded slabs.

    Call ONCE per parameter set (outside the jitted forward)."""
    f32 = jnp.float32
    w_ih = params["w_ih"].astype(f32).reshape(4, HIDDEN, INPUT_SIZE)  # (4,50,11)
    w_hh = params["w_hh"].astype(f32).reshape(4, HIDDEN, HIDDEN)      # (4,50,50)
    b = (params["b_ih"] + params["b_hh"]).astype(f32).reshape(4, HIDDEN)

    wih_slab = jnp.zeros((HP, 4 * HP), f32)
    whh_slab = jnp.zeros((HP, 4 * HP), f32)
    b_cat = jnp.zeros((1, 4 * HP), f32)
    for g in range(4):                        # gate order i, f, g, o (PyTorch)
        wih_slab = wih_slab.at[:INPUT_SIZE, g * HP:g * HP + HIDDEN].set(w_ih[g].T)
        whh_slab = whh_slab.at[:HIDDEN, g * HP:g * HP + HIDDEN].set(w_hh[g].T)
        b_cat = b_cat.at[0, g * HP:g * HP + HIDDEN].set(b[g])

    w_lin = jnp.zeros((HP, HP), f32).at[:HIDDEN, :OUT_DIM].set(
        params["w_lin"].astype(f32).T)
    b_lin = jnp.zeros((1, HP), f32).at[0, :OUT_DIM].set(
        params["b_lin"].astype(f32))
    return {
        "w_ih": wih_slab.astype(compute_dtype),
        "w_hh": whh_slab.astype(compute_dtype),
        "b_cat": b_cat,
        "w_lin": w_lin.astype(compute_dtype),
        "b_lin": b_lin,
    }


def _pick_bb(batch):
    b8 = _round_up(batch, 8)
    if b8 <= 8:
        return 8
    # Maximize rows per serial step, but keep >= 2 batch blocks so v7x's two
    # TensorCores both get work along the "parallel" grid axis.
    for bb in (64, 32, 16, 8):
        if 2 * bb <= b8:
            return bb
    return 8


def _pick_tiles(batch, seq):
    bb = _pick_bb(batch)
    pre_chunk = max(1, 64 // bb)       # bulk pre-gate chunk   (~64 LHS rows)
    proj_chunk = max(1, 128 // bb)     # bulk projection chunk (~128 LHS rows)
    tt_cap = min(MAX_TT, max(proj_chunk, VMEM_ROW_BUDGET // bb))
    tt_cap = max(proj_chunk, (tt_cap // proj_chunk) * proj_chunk)
    t_need = _round_up(seq, proj_chunk)
    tt = t_need if t_need <= tt_cap else tt_cap
    return bb, tt, pre_chunk, proj_chunk


def joint_model_forward(x, packed):
    """x: (B, T, 11) float32, packed = pack_params(...)  ->  (B, T, 4) float32."""
    B, T, F = x.shape
    assert F == INPUT_SIZE
    cdt = packed["w_hh"].dtype

    bb, tt, pre_chunk, proj_chunk = _pick_tiles(B, T)
    b_pad = _round_up(B, bb)
    t_pad = _round_up(T, tt)

    # Time-major, batch/lane-padded input slab: (T_pad, B_pad, 128).
    x_tm = jnp.transpose(x.astype(jnp.float32), (1, 0, 2))
    x_pad = jnp.zeros((t_pad, b_pad, HP), jnp.float32)
    x_pad = x_pad.at[:T, :B, :INPUT_SIZE].set(x_tm)

    grid = (b_pad // bb, t_pad // tt)

    out_tm = pl.pallas_call(
        functools.partial(_lstm_block_kernel, tt=tt, bb=bb,
                          pre_chunk=pre_chunk, proj_chunk=proj_chunk, cdt=cdt),
        out_shape=jax.ShapeDtypeStruct((t_pad, b_pad, HP), jnp.float32),
        grid_spec=pltpu.PrefetchScalarGridSpec(
            num_scalar_prefetch=0,
            grid=grid,
            in_specs=[
                pl.BlockSpec((tt, bb, HP), lambda b, t: (t, b, 0)),
                pl.BlockSpec((HP, 4 * HP), lambda b, t: (0, 0)),
                pl.BlockSpec((HP, 4 * HP), lambda b, t: (0, 0)),
                pl.BlockSpec((1, 4 * HP), lambda b, t: (0, 0)),
                pl.BlockSpec((HP, HP), lambda b, t: (0, 0)),
                pl.BlockSpec((1, HP), lambda b, t: (0, 0)),
            ],
            out_specs=pl.BlockSpec((tt, bb, HP), lambda b, t: (t, b, 0)),
            scratch_shapes=[
                pltpu.VMEM((bb, HP), jnp.float32),           # h state (across t blocks)
                pltpu.VMEM((bb, HP), jnp.float32),           # c state
                pltpu.VMEM((tt, bb, 4 * HP), jnp.float32),   # pre-gates for this block
            ],
        ),
        compiler_params=pltpu.CompilerParams(
            # Batch blocks are independent (megacore-parallel on v7x);
            # time is a serial recurrence and must stay "arbitrary" (and last).
            dimension_semantics=("parallel", "arbitrary"),
            vmem_limit_bytes=48 * 1024 * 1024,
        ),
    )(x_pad, packed["w_ih"], packed["w_hh"], packed["b_cat"],
      packed["w_lin"], packed["b_lin"])

    return jnp.transpose(out_tm[:T, :B, :OUT_DIM], (1, 0, 2))


def reference_forward(x, params):
    """Pure-JAX reference matching torch.nn.LSTM + Linear semantics."""
    B, T, _ = x.shape
    wih, whh = params["w_ih"], params["w_hh"]
    b = params["b_ih"] + params["b_hh"]

    def step(carry, x_t):
        h, c = carry
        gates = x_t @ wih.T + h @ whh.T + b
        i = jax.nn.sigmoid(gates[:, 0 * HIDDEN:1 * HIDDEN])
        f = jax.nn.sigmoid(gates[:, 1 * HIDDEN:2 * HIDDEN])
        g = jnp.tanh(gates[:, 2 * HIDDEN:3 * HIDDEN])
        o = jax.nn.sigmoid(gates[:, 3 * HIDDEN:4 * HIDDEN])
        c = f * c + i * g
        h = o * jnp.tanh(c)
        return (h, c), h

    h0 = jnp.zeros((B, HIDDEN), jnp.float32)
    c0 = jnp.zeros((B, HIDDEN), jnp.float32)
    _, hs = lax.scan(step, (h0, c0), jnp.transpose(x, (1, 0, 2)))
    hs = jnp.transpose(hs, (1, 0, 2))  # (B, T, 50)
    return hs @ params["w_lin"].T + params["b_lin"]


def init_params(key):
    """Deterministic init; PyTorch-style uniform(-1/sqrt(H), 1/sqrt(H))."""
    k = 1.0 / jnp.sqrt(jnp.float32(HIDDEN))
    keys = jax.random.split(key, 6)
    u = lambda kk, shape: jax.random.uniform(kk, shape, jnp.float32, -k, k)
    return {
        "w_ih": u(keys[0], (4 * HIDDEN, INPUT_SIZE)),
        "w_hh": u(keys[1], (4 * HIDDEN, HIDDEN)),
        "b_ih": u(keys[2], (4 * HIDDEN,)),
        "b_hh": u(keys[3], (4 * HIDDEN,)),
        "w_lin": u(keys[4], (OUT_DIM, HIDDEN)),
        "b_lin": u(keys[5], (OUT_DIM,)),
    }


if __name__ == "__main__":
    key = jax.random.PRNGKey(0)
    pkey, xkey = jax.random.split(key)
    params = init_params(pkey)

    B, T = 2, 8
    x = jax.random.normal(xkey, (B, T, INPUT_SIZE), jnp.float32)
    ref = jax.block_until_ready(reference_forward(x, params))

    fwd = jax.jit(joint_model_forward)

    # Default (perf) path: bf16 MXU operands, f32 accumulation / elementwise.
    packed_bf16 = pack_params(params, jnp.bfloat16)
    out_bf16 = jax.block_until_ready(fwd(x, packed_bf16))
    assert out_bf16.shape == (B, T, OUT_DIM), out_bf16.shape
    err_bf16 = float(jnp.max(jnp.abs(out_bf16 - ref)))
    assert jnp.allclose(out_bf16, ref, atol=1e-2, rtol=1e-2), err_bf16

    # f32 precision path: exact-semantics check against the PyTorch-style reference.
    packed_f32 = pack_params(params, jnp.float32)
    out_f32 = jax.block_until_ready(fwd(x, packed_f32))
    err_f32 = float(jnp.max(jnp.abs(out_f32 - ref)))
    assert jnp.allclose(out_f32, ref, atol=1e-4, rtol=1e-4), err_f32

    print("KERNEL_OK")
</pallas_src>

<mosaic_0001>
module attributes {stable_mosaic.version = 11 : i64} {
  func.func @_lstm_block_kernel(%arg0: i32, %arg1: i32, %arg2: memref<16x8x128xf32, #tpu.memory_space<vmem>>, %arg3: memref<128x512xbf16, #tpu.memory_space<vmem>>, %arg4: memref<128x512xbf16, #tpu.memory_space<vmem>>, %arg5: memref<1x512xf32, #tpu.memory_space<vmem>>, %arg6: memref<128x128xbf16, #tpu.memory_space<vmem>>, %arg7: memref<1x128xf32, #tpu.memory_space<vmem>>, %arg8: memref<16x8x128xf32, #tpu.memory_space<vmem>>, %arg9: memref<8x128xf32, #tpu.memory_space<vmem>>, %arg10: memref<8x128xf32, #tpu.memory_space<vmem>>, %arg11: memref<16x8x512xf32, #tpu.memory_space<vmem>>) attributes {dimension_semantics = [#tpu.dimension_semantics<parallel>, #tpu.dimension_semantics<arbitrary>], iteration_bounds = array<i64: 1, 1>, scalar_prefetch = 0 : i64, scratch_operands = 3 : i64, tpu.core_type = #tpu.core_type<tc>, window_params = [{transform_indices = @transform_0, window_bounds = array<i64: 16, 8, 128>}, {pipeline_mode = #tpu.pipeline_mode<synchronous>, transform_indices = @transform_1, window_bounds = array<i64: 128, 512>}, {pipeline_mode = #tpu.pipeline_mode<synchronous>, transform_indices = @transform_2, window_bounds = array<i64: 128, 512>}, {pipeline_mode = #tpu.pipeline_mode<synchronous>, transform_indices = @transform_3, window_bounds = array<i64: 1, 512>}, {pipeline_mode = #tpu.pipeline_mode<synchronous>, transform_indices = @transform_4, window_bounds = array<i64: 128, 128>}, {pipeline_mode = #tpu.pipeline_mode<synchronous>, transform_indices = @transform_5, window_bounds = array<i64: 1, 128>}, {transform_indices = @transform_6, window_bounds = array<i64: 16, 8, 128>}]} {
    %c0_i32 = arith.constant 0 : i32
    %0 = arith.cmpi eq, %arg1, %c0_i32 : i32
    %1 = arith.extui %0 : i1 to i32
    %c0_i32_0 = arith.constant 0 : i32
    %2 = arith.cmpi ne, %1, %c0_i32_0 : i32
    scf.if %2 {
      %cst_27 = arith.constant 0.000000e+00 : f32
      %27 = vector.broadcast %cst_27 : f32 to vector<8x128xf32>
      %c0_28 = arith.constant 0 : index
      %c0_29 = arith.constant 0 : index
      %28 = vector.load %arg9[%c0_28, %c0_29] : memref<8x128xf32, #tpu.memory_space<vmem>>, vector<8x128xf32>
      tpu.vector_store %arg9[%c0_28, %c0_29], %27 {strides = array<i32>} : memref<8x128xf32, #tpu.memory_space<vmem>>, vector<8x128xf32>,
      %cst_30 = arith.constant 0.000000e+00 : f32
      %29 = vector.broadcast %cst_30 : f32 to vector<8x128xf32>
      %c0_31 = arith.constant 0 : index
      %c0_32 = arith.constant 0 : index
      %30 = vector.load %arg10[%c0_31, %c0_32] : memref<8x128xf32, #tpu.memory_space<vmem>>, vector<8x128xf32>
      tpu.vector_store %arg10[%c0_31, %c0_32], %29 {strides = array<i32>} : memref<8x128xf32, #tpu.memory_space<vmem>>, vector<8x128xf32>,
    } else {
    }
    %c0_i32_1 = arith.constant 0 : i32
    %c2_i32 = arith.constant 2 : i32
    %3 = arith.addi %c0_i32_1, %c2_i32 : i32
    %c1_i32 = arith.constant 1 : i32
    scf.for %arg12 = %c0_i32_1 to %3 step %c1_i32  : i32 {
      %c1_i32_27 = arith.constant 1 : i32
      %27 = arith.muli %arg12, %c1_i32_27 : i32
      %c0_i32_28 = arith.constant 0 : i32
      %28 = arith.addi %c0_i32_28, %27 : i32
      %c8_i32_29 = arith.constant 8 : i32
      %29 = arith.muli %28, %c8_i32_29 : i32
      %30 = tpu.assume_multiple %29, 8 : i32
      %31 = arith.index_cast %30 : i32 to index
      %c0_30 = arith.constant 0 : index
      %c0_31 = arith.constant 0 : index
      %32 = vector.load %arg2[%31, %c0_30, %c0_31] : memref<16x8x128xf32, #tpu.memory_space<vmem>>, vector<8x8x128xf32>
      %33 = vector.shape_cast %32 : vector<8x8x128xf32> to vector<64x128xf32>
      %34 = arith.truncf %33 : vector<64x128xf32> to vector<64x128xbf16>
      %c0_32 = arith.constant 0 : index
      %c0_33 = arith.constant 0 : index
      %35 = vector.load %arg3[%c0_32, %c0_33] : memref<128x512xbf16, #tpu.memory_space<vmem>>, vector<128x512xbf16>
      %cst_34 = arith.constant dense<0.000000e+00> : vector<64x512xf32>
      %36 = tpu.matmul %34, %35, %cst_34 {dimension_numbers = #tpu.dot_dimension_numbers<[1], [0], [0], [1], [0, 0, 1, 1], [], []>} : vector<64x128xbf16>, vector<128x512xbf16>, vector<64x512xf32> -> vector<64x512xf32>
      %c0_35 = arith.constant 0 : index
      %c0_36 = arith.constant 0 : index
      %37 = vector.load %arg5[%c0_35, %c0_36] : memref<1x512xf32, #tpu.memory_space<vmem>>, vector<1x512xf32>
      %38 = vector.broadcast %37 : vector<1x512xf32> to vector<64x512xf32>
      %39 = arith.addf %36, %38 : vector<64x512xf32>
      %40 = vector.shape_cast %39 : vector<64x512xf32> to vector<8x8x512xf32>
      %41 = arith.index_cast %30 : i32 to index
      %c0_37 = arith.constant 0 : index
      %c0_38 = arith.constant 0 : index
      %42 = vector.load %arg11[%41, %c0_37, %c0_38] : memref<16x8x512xf32, #tpu.memory_space<vmem>>, vector<8x8x512xf32>
      tpu.vector_store %arg11[%41, %c0_37, %c0_38], %40 {strides = array<i32>} : memref<16x8x512xf32, #tpu.memory_space<vmem>>, vector<8x8x512xf32>,
    }
    %c2_i32_2 = arith.constant 2 : i32
    %c0 = arith.constant 0 : index
    %c0_3 = arith.constant 0 : index
    %4 = vector.load %arg4[%c0, %c0_3] : memref<128x512xbf16, #tpu.memory_space<vmem>>, vector<128x512xbf16>
    %c0_4 = arith.constant 0 : index
    %c0_5 = arith.constant 0 : index
    %5 = vector.load %arg9[%c0_4, %c0_5] : memref<8x128xf32, #tpu.memory_space<vmem>>, vector<8x128xf32>
    %c0_6 = arith.constant 0 : index
    %c0_7 = arith.constant 0 : index
    %6 = vector.load %arg10[%c0_6, %c0_7] : memref<8x128xf32, #tpu.memory_space<vmem>>, vector<8x128xf32>
    %c0_i32_8 = arith.constant 0 : i32
    %c8_i32 = arith.constant 8 : i32
    %7 = arith.addi %c0_i32_8, %c8_i32 : i32
    %c1_i32_9 = arith.constant 1 : i32
    %8:2 = scf.for %arg12 = %c0_i32_8 to %7 step %c1_i32_9 iter_args(%arg13 = %5, %arg14 = %6) -> (vector<8x128xf32>, vector<8x128xf32>)  : i32 {
      %c2_i32_27 = arith.constant 2 : i32
      %27 = arith.muli %arg12, %c2_i32_27 : i32
      %28 = tpu.assume_multiple %27, 2 : i32
      %29 = arith.index_cast %28 : i32 to index
      %c0_28 = arith.constant 0 : index
      %c0_29 = arith.constant 0 : index
      %30 = vector.load %arg11[%29, %c0_28, %c0_29] : memref<16x8x512xf32, #tpu.memory_space<vmem>>, vector<1x8x512xf32>
      %31 = vector.shape_cast %30 : vector<1x8x512xf32> to vector<8x512xf32>
      %32 = arith.truncf %arg13 : vector<8x128xf32> to vector<8x128xbf16>
      %cst_30 = arith.constant dense<0.000000e+00> : vector<8x512xf32>
      %33 = tpu.matmul %32, %4, %cst_30 {dimension_numbers = #tpu.dot_dimension_numbers<[1], [0], [0], [1], [0, 0, 1, 1], [], []>} : vector<8x128xbf16>, vector<128x512xbf16>, vector<8x512xf32> -> vector<8x512xf32>
      %34 = arith.addf %31, %33 : vector<8x512xf32>
      %35 = vector.extract_strided_slice %34 {offsets = [0, 0], sizes = [8, 128], strides = [1, 1]} : vector<8x512xf32> to vector<8x128xf32>
      %cst_31 = arith.constant 5.000000e-01 : f32
      %36 = vector.broadcast %cst_31 : f32 to vector<8x128xf32>
      %37 = arith.mulf %36, %35 : vector<8x128xf32>
      %38 = math.tanh %37 : vector<8x128xf32>
      %cst_32 = arith.constant 5.000000e-01 : f32
      %39 = vector.broadcast %cst_32 : f32 to vector<8x128xf32>
      %40 = arith.mulf %39, %38 : vector<8x128xf32>
      %cst_33 = arith.constant 5.000000e-01 : f32
      %41 = vector.broadcast %cst_33 : f32 to vector<8x128xf32>
      %42 = arith.addf %40, %41 : vector<8x128xf32>
      %43 = vector.extract_strided_slice %34 {offsets = [0, 128], sizes = [8, 128], strides = [1, 1]} : vector<8x512xf32> to vector<8x128xf32>
      %cst_34 = arith.constant 5.000000e-01 : f32
      %44 = vector.broadcast %cst_34 : f32 to vector<8x128xf32>
      %45 = arith.mulf %44, %43 : vector<8x128xf32>
      %46 = math.tanh %45 : vector<8x128xf32>
      %cst_35 = arith.constant 5.000000e-01 : f32
      %47 = vector.broadcast %cst_35 : f32 to vector<8x128xf32>
      %48 = arith.mulf %47, %46 : vector<8x128xf32>
      %cst_36 = arith.constant 5.000000e-01 : f32
      %49 = vector.broadcast %cst_36 : f32 to vector<8x128xf32>
      %50 = arith.addf %48, %49 : vector<8x128xf32>
      %51 = vector.extract_strided_slice %34 {offsets = [0, 256], sizes = [8, 128], strides = [1, 1]} : vector<8x512xf32> to vector<8x128xf32>
      %52 = math.tanh %51 : vector<8x128xf32>
      %53 = vector.extract_strided_slice %34 {offsets = [0, 384], sizes = [8, 128], strides = [1, 1]} : vector<8x512xf32> to vector<8x128xf32>
      %cst_37 = arith.constant 5.000000e-01 : f32
      %54 = vector.broadcast %cst_37 : f32 to vector<8x128xf32>
      %55 = arith.mulf %54, %53 : vector<8x128xf32>
      %56 = math.tanh %55 : vector<8x128xf32>
      %cst_38 = arith.constant 5.000000e-01 : f32
      %57 = vector.broadcast %cst_38 : f32 to vector<8x128xf32>
      %58 = arith.mulf %57, %56 : vector<8x128xf32>
      %cst_39 = arith.constant 5.000000e-01 : f32
      %59 = vector.broadcast %cst_39 : f32 to vector<8x128xf32>
      %60 = arith.addf %58, %59 : vector<8x128xf32>
      %61 = arith.mulf %50, %arg14 : vector<8x128xf32>
      %62 = arith.mulf %42, %52 : vector<8x128xf32>
      %63 = arith.addf %61, %62 : vector<8x128xf32>
      %64 = math.tanh %63 : vector<8x128xf32>
      %65 = arith.mulf %60, %64 : vector<8x128xf32>
      %66 = arith.index_cast %28 : i32 to index
      %c0_40 = arith.constant 0 : index
      %c0_41 = arith.constant 0 : index
      %67 = vector.load %arg8[%66, %c0_40, %c0_41] : memref<16x8x128xf32, #tpu.memory_space<vmem>>, vector<1x8x128xf32>
      %68 = vector.shape_cast %67 : vector<1x8x128xf32> to vector<8x128xf32>
      %69 = vector.shape_cast %65 : vector<8x128xf32> to vector<1x8x128xf32>
      tpu.vector_store %arg8[%66, %c0_40, %c0_41], %69 {strides = array<i32>} : memref<16x8x128xf32, #tpu.memory_space<vmem>>, vector<1x8x128xf32>,
      %c1_i32_42 = arith.constant 1 : i32
      %70 = arith.addi %28, %c1_i32_42 : i32
      %71 = arith.index_cast %70 : i32 to index
      %c0_43 = arith.constant 0 : index
      %c0_44 = arith.constant 0 : index
      %72 = vector.load %arg11[%71, %c0_43, %c0_44] : memref<16x8x512xf32, #tpu.memory_space<vmem>>, vector<1x8x512xf32>
      %73 = vector.shape_cast %72 : vector<1x8x512xf32> to vector<8x512xf32>
      %74 = arith.truncf %65 : vector<8x128xf32> to vector<8x128xbf16>
      %cst_45 = arith.constant dense<0.000000e+00> : vector<8x512xf32>
      %75 = tpu.matmul %74, %4, %cst_45 {dimension_numbers = #tpu.dot_dimension_numbers<[1], [0], [0], [1], [0, 0, 1, 1], [], []>} : vector<8x128xbf16>, vector<128x512xbf16>, vector<8x512xf32> -> vector<8x512xf32>
      %76 = arith.addf %73, %75 : vector<8x512xf32>
      %77 = vector.extract_strided_slice %76 {offsets = [0, 0], sizes = [8, 128], strides = [1, 1]} : vector<8x512xf32> to vector<8x128xf32>
      %cst_46 = arith.constant 5.000000e-01 : f32
      %78 = vector.broadcast %cst_46 : f32 to vector<8x128xf32>
      %79 = arith.mulf %78, %77 : vector<8x128xf32>
      %80 = math.tanh %79 : vector<8x128xf32>
      %cst_47 = arith.constant 5.000000e-01 : f32
      %81 = vector.broadcast %cst_47 : f32 to vector<8x128xf32>
      %82 = arith.mulf %81, %80 : vector<8x128xf32>
      %cst_48 = arith.constant 5.000000e-01 : f32
      %83 = vector.broadcast %cst_48 : f32 to vector<8x128xf32>
      %84 = arith.addf %82, %83 : vector<8x128xf32>
      %85 = vector.extract_strided_slice %76 {offsets = [0, 128], sizes = [8, 128], strides = [1, 1]} : vector<8x512xf32> to vector<8x128xf32>
      %cst_49 = arith.constant 5.000000e-01 : f32
      %86 = vector.broadcast %cst_49 : f32 to vector<8x128xf32>
      %87 = arith.mulf %86, %85 : vector<8x128xf32>
      %88 = math.tanh %87 : vector<8x128xf32>
      %cst_50 = arith.constant 5.000000e-01 : f32
      %89 = vector.broadcast %cst_50 : f32 to vector<8x128xf32>
      %90 = arith.mulf %89, %88 : vector<8x128xf32>
      %cst_51 = arith.constant 5.000000e-01 : f32
      %91 = vector.broadcast %cst_51 : f32 to vector<8x128xf32>
      %92 = arith.addf %90, %91 : vector<8x128xf32>
      %93 = vector.extract_strided_slice %76 {offsets = [0, 256], sizes = [8, 128], strides = [1, 1]} : vector<8x512xf32> to vector<8x128xf32>
      %94 = math.tanh %93 : vector<8x128xf32>
      %95 = vector.extract_strided_slice %76 {offsets = [0, 384], sizes = [8, 128], strides = [1, 1]} : vector<8x512xf32> to vector<8x128xf32>
      %cst_52 = arith.constant 5.000000e-01 : f32
      %96 = vector.broadcast %cst_52 : f32 to vector<8x128xf32>
      %97 = arith.mulf %96, %95 : vector<8x128xf32>
      %98 = math.tanh %97 : vector<8x128xf32>
      %cst_53 = arith.constant 5.000000e-01 : f32
      %99 = vector.broadcast %cst_53 : f32 to vector<8x128xf32>
      %100 = arith.mulf %99, %98 : vector<8x128xf32>
      %cst_54 = arith.constant 5.000000e-01 : f32
      %101 = vector.broadcast %cst_54 : f32 to vector<8x128xf32>
      %102 = arith.addf %100, %101 : vector<8x128xf32>
      %103 = arith.mulf %92, %63 : vector<8x128xf32>
      %104 = arith.mulf %84, %94 : vector<8x128xf32>
      %105 = arith.addf %103, %104 : vector<8x128xf32>
      %106 = math.tanh %105 : vector<8x128xf32>
      %107 = arith.mulf %102, %106 : vector<8x128xf32>
      %108 = arith.index_cast %70 : i32 to index
      %c0_55 = arith.constant 0 : index
      %c0_56 = arith.constant 0 : index
      %109 = vector.load %arg8[%108, %c0_55, %c0_56] : memref<16x8x128xf32, #tpu.memory_space<vmem>>, vector<1x8x128xf32>
      %110 = vector.shape_cast %109 : vector<1x8x128xf32> to vector<8x128xf32>
      %111 = vector.shape_cast %107 : vector<8x128xf32> to vector<1x8x128xf32>
      tpu.vector_store %arg8[%108, %c0_55, %c0_56], %111 {strides = array<i32>} : memref<16x8x128xf32, #tpu.memory_space<vmem>>, vector<1x8x128xf32>,
      scf.yield %107, %105 : vector<8x128xf32>, vector<8x128xf32>
    }
    %c8_i32_10 = arith.constant 8 : i32
    %c0_11 = arith.constant 0 : index
    %c0_12 = arith.constant 0 : index
    %9 = vector.load %arg9[%c0_11, %c0_12] : memref<8x128xf32, #tpu.memory_space<vmem>>, vector<8x128xf32>
    tpu.vector_store %arg9[%c0_11, %c0_12], %8#0 {strides = array<i32>} : memref<8x128xf32, #tpu.memory_space<vmem>>, vector<8x128xf32>,
    %c0_13 = arith.constant 0 : index
    %c0_14 = arith.constant 0 : index
    %10 = vector.load %arg10[%c0_13, %c0_14] : memref<8x128xf32, #tpu.memory_space<vmem>>, vector<8x128xf32>
    tpu.vector_store %arg10[%c0_13, %c0_14], %8#1 {strides = array<i32>} : memref<8x128xf32, #tpu.memory_space<vmem>>, vector<8x128xf32>,
    %c0_i32_15 = arith.constant 0 : i32
    %c1_i32_16 = arith.constant 1 : i32
    %11 = arith.muli %c0_i32_15, %c1_i32_16 : i32
    %c0_i32_17 = arith.constant 0 : i32
    %12 = arith.addi %c0_i32_17, %11 : i32
    %c16_i32 = arith.constant 16 : i32
    %13 = arith.muli %12, %c16_i32 : i32
    %14 = tpu.assume_multiple %13, 16 : i32
    %15 = arith.index_cast %14 : i32 to index
    %c0_18 = arith.constant 0 : index
    %c0_19 = arith.constant 0 : index
    %16 = vector.load %arg8[%15, %c0_18, %c0_19] : memref<16x8x128xf32, #tpu.memory_space<vmem>>, vector<16x8x128xf32>
    %17 = vector.shape_cast %16 : vector<16x8x128xf32> to vector<128x128xf32>
    %18 = arith.truncf %17 : vector<128x128xf32> to vector<128x128xbf16>
    %c0_20 = arith.constant 0 : index
    %c0_21 = arith.constant 0 : index
    %19 = vector.load %arg6[%c0_20, %c0_21] : memref<128x128xbf16, #tpu.memory_space<vmem>>, vector<128x128xbf16>
    %cst = arith.constant dense<0.000000e+00> : vector<128x128xf32>
    %20 = tpu.matmul %18, %19, %cst {dimension_numbers = #tpu.dot_dimension_numbers<[1], [0], [0], [1], [0, 0, 1, 1], [], []>} : vector<128x128xbf16>, vector<128x128xbf16>, vector<128x128xf32> -> vector<128x128xf32>
    %c0_22 = arith.constant 0 : index
    %c0_23 = arith.constant 0 : index
    %21 = vector.load %arg7[%c0_22, %c0_23] : memref<1x128xf32, #tpu.memory_space<vmem>>, vector<1x128xf32>
    %22 = vector.broadcast %21 : vector<1x128xf32> to vector<128x128xf32>
    %23 = arith.addf %20, %22 : vector<128x128xf32>
    %24 = vector.shape_cast %23 : vector<128x128xf32> to vector<16x8x128xf32>
    %25 = arith.index_cast %14 : i32 to index
    %c0_24 = arith.constant 0 : index
    %c0_25 = arith.constant 0 : index
    %26 = vector.load %arg8[%25, %c0_24, %c0_25] : memref<16x8x128xf32, #tpu.memory_space<vmem>>, vector<16x8x128xf32>
    tpu.vector_store %arg8[%25, %c0_24, %c0_25], %24 {strides = array<i32>} : memref<16x8x128xf32, #tpu.memory_space<vmem>>, vector<16x8x128xf32>,
    %c1_i32_26 = arith.constant 1 : i32
    return
  }
  func.func @transform_0(%arg0: i32, %arg1: i32) -> (i32, i32, i32) {
    %c0_i32 = arith.constant 0 : i32
    %c0_i32_0 = arith.constant 0 : i32
    return %arg1, %arg0, %c0_i32 : i32, i32, i32
  }
  func.func @transform_1(%arg0: i32, %arg1: i32) -> (i32, i32) {
    %c0_i32 = arith.constant 0 : i32
    %c0_i32_0 = arith.constant 0 : i32
    %c0_i32_1 = arith.constant 0 : i32
    return %c0_i32, %c0_i32_0 : i32, i32
  }
  func.func @transform_2(%arg0: i32, %arg1: i32) -> (i32, i32) {
    %c0_i32 = arith.constant 0 : i32
    %c0_i32_0 = arith.constant 0 : i32
    %c0_i32_1 = arith.constant 0 : i32
    return %c0_i32, %c0_i32_0 : i32, i32
  }
  func.func @transform_3(%arg0: i32, %arg1: i32) -> (i32, i32) {
    %c0_i32 = arith.constant 0 : i32
    %c0_i32_0 = arith.constant 0 : i32
    %c0_i32_1 = arith.constant 0 : i32
    return %c0_i32, %c0_i32_0 : i32, i32
  }
  func.func @transform_4(%arg0: i32, %arg1: i32) -> (i32, i32) {
    %c0_i32 = arith.constant 0 : i32
    %c0_i32_0 = arith.constant 0 : i32
    %c0_i32_1 = arith.constant 0 : i32
    return %c0_i32, %c0_i32_0 : i32, i32
  }
  func.func @transform_5(%arg0: i32, %arg1: i32) -> (i32, i32) {
    %c0_i32 = arith.constant 0 : i32
    %c0_i32_0 = arith.constant 0 : i32
    %c0_i32_1 = arith.constant 0 : i32
    return %c0_i32, %c0_i32_0 : i32, i32
  }
  func.func @transform_6(%arg0: i32, %arg1: i32) -> (i32, i32, i32) {
    %c0_i32 = arith.constant 0 : i32
    %c0_i32_0 = arith.constant 0 : i32
    return %arg1, %arg0, %c0_i32 : i32, i32, i32
  }
}

</mosaic_0001>

<bundles_post_ra>
// kernel: joint_model_forward.1
= control target key start
LH: loop header
LB: loop body
LE: loop exit
PB: predicated region body
PF: predicated region fallthrough
CT: control target
= control target key end

     0   :  { %11 = vsyncpa [#allocation6], 0  ;;  %s2092_s0 = inlined_call_operand.vmem [shape: f32[16,8,128], index: 0, kind: input, shape index: {}]   ;;  %s2093_s1 = inlined_call_operand.hbm [shape: bf16[128,512], index: 1, kind: input, shape index: {}]   ;;  %s2094_s2 = inlined_call_operand.hbm [shape: bf16[128,512], index: 2, kind: input, shape index: {}]   ;;  %s2095_s3 = inlined_call_operand.vmem [shape: f32[1,512], index: 3, kind: input, shape index: {}]   ;;  %s2096_s4 = inlined_call_operand.vmem [shape: bf16[128,128], index: 4, kind: input, shape index: {}]   ;;  %s2097_s5 = inlined_call_operand.vmem [shape: f32[1,128], index: 5, kind: input, shape index: {}]   ;;  %s2098_s6 = inlined_call_operand.vmem [shape: f32[16,8,128], index: 6, kind: output, shape index: {}]  }
   0x1   :  { %s19_s23 = sshll.u32 %s2093_s1, 4  ;;  %s20_s23 = int_to_ptr.hbm [resolvable:$true] %s19_s23 }
   0x2   :  { %12 = vsyncpa [#allocation8], 0  ;;  %s1559_s24 = smov [#allocation5]   ;;  %s32_s28 = sshll.u32 %s2094_s2, 4  ;;  %s33_s28 = int_to_ptr.hbm [resolvable:$true] %s32_s28 }
   0x3   :  { %s21_s25 = sshll.u32 %s1559_s24, 4  ;;  %s1560_s29 = smov 256   ;;  %s22_s25 = int_to_ptr.vmem [resolvable:$true] %s21_s25 }
   0x4   :  { %s1561_s30 = smov 16   ;;  %s1562_s7 = smov [#allocation7]  }
   0x5   :  { %27 = dma.hbm_to_vmem [thread:$0]  %s20_s23, 4096, %s22_s25, [#allocation6], %s1560_s29, %s1560_s29, %s1561_s30  }
   0x6   :  { %s34_s8 = sshll.u32 %s1562_s7, 4  ;;  %s35_s8 = int_to_ptr.vmem [resolvable:$true] %s34_s8 }
   0x7   :  { %40 = dma.hbm_to_vmem [thread:$0]  %s33_s28, 4096, %s35_s8, [#allocation8], %s1560_s29, %s1560_s29, %s1561_s30  }
   0x8   :  { %1539 = dma.done.wait [#allocation6], 4096  }
   0x9   :  { %1540 = vsyncadd [#allocation6], 4294963200 }
   0xa   :  { %1541 = dma.done.wait [#allocation8], 4096  }
   0xb   :  { %1542 = vsyncadd [#allocation8], 4294963200  ;;  %v1563_v0 = vmov 0.0   ;;  %s1605_s1 = smov 0  }
   0xc   :  { %59 = vst [vmem:[#allocation2] sm:$0xff] %v1563_v0 }
   0xd   :  { %60 = vst [vmem:[#allocation3] sm:$0xff] %v1563_v0 }
   0xe LB: > { %v1124_v1 = vld [vmem:[#allocation5 + $0xe0] sm:$0xf]  ;;  %v1344_v2 = vld [vmem:[#allocation5 + $0xec] sm:$0xf0]  ;;  %v1342_v3 = vld [vmem:[#allocation5 + $0xe4] sm:$0xf]  ;;  %s1545_s1 = sphi %s1605_s1, %s66_s1  }
   0xf   : > { %v1125_v4 = vor.u32 %v1344_v2, %v1124_v1  ;;  %v1126_v5 = vld [vmem:[#allocation5 + $0xf0] sm:$0xf0]  ;;  %v1132_v6 = vld [vmem:[#allocation5 + $0xe8] sm:$0xf]  ;;  %v1345_v7 = vld [vmem:[#allocation5 + $0xf4] sm:$0xf0] }
  0x10   : > { %v1129_v8 = vor.u32 %v1342_v3, %v1126_v5  ;;  %v1133_v9 = vor.u32 %v1345_v7, %v1132_v6  ;;  %v1343_v10 = vld [vmem:[#allocation5 + $0xec] sm:$0xf]  ;;  %v1134_v11 = vld [vmem:[#allocation5 + $0xf8] sm:$0xf0]  ;;  %v1108_v12 = vld [vmem:[#allocation5 + $0xc0] sm:$0xf] }
  0x11   : > { %284 = vmatpush.bf16.msra.mxu0 %v1125_v4  ;;  %v1137_v13 = vor.u32 %v1343_v10, %v1134_v11  ;;  %v1340_v14 = vld [vmem:[#allocation5 + $0xcc] sm:$0xf0]  ;;  %v1338_v15 = vld [vmem:[#allocation5 + $0xc4] sm:$0xf]  ;;  %v1110_v16 = vld [vmem:[#allocation5 + $0xd0] sm:$0xf0] }
  0x12   : > { %313 = vmatpush.bf16.msra.mxu1 %v1129_v8  ;;  %342 = vmatpush.bf16.msra.mxu2 %v1133_v9  ;;  %v1109_v17 = vor.u32 %v1340_v14, %v1108_v12  ;;  %v1113_v18 = vor.u32 %v1338_v15, %v1110_v16  ;;  %v1116_v19 = vld [vmem:[#allocation5 + $0xc8] sm:$0xf]  ;;  %v1341_v20 = vld [vmem:[#allocation5 + $0xd4] sm:$0xf0]  ;;  %v1339_v21 = vld [vmem:[#allocation5 + $0xcc] sm:$0xf] }
  0x13   : > { %371 = vmatpush.bf16.msra.mxu3 %v1137_v13  ;;  %v1117_v22 = vor.u32 %v1341_v20, %v1116_v19  ;;  %v1118_v23 = vld [vmem:[#allocation5 + $0xd8] sm:$0xf0]  ;;  %v1092_v24 = vld [vmem:[#allocation5 + $0xa0] sm:$0xf]  ;;  %v1336_v25 = vld [vmem:[#allocation5 + $0xac] sm:$0xf0] }
  0x14   : > { %v1121_v26 = vor.u32 %v1339_v21, %v1118_v23  ;;  %v1334_v27 = vld [vmem:[#allocation5 + $0xa4] sm:$0xf]  ;;  %v1094_v28 = vld [vmem:[#allocation5 + $0xb0] sm:$0xf0]  ;;  %v1100_v29 = vld [vmem:[#allocation5 + $0xa8] sm:$0xf]  ;;  %v1093_v30 = vor.u32 %v1336_v25, %v1092_v24 }
  0x15   : > { %285 = vmatpush.bf16.msra.mxu0 %v1109_v17  ;;  %v1337_v31 = vld [vmem:[#allocation5 + $0xb4] sm:$0xf0]  ;;  %v1335_v32 = vld [vmem:[#allocation5 + $0xac] sm:$0xf]  ;;  %v1102_v33 = vld [vmem:[#allocation5 + $0xb8] sm:$0xf0]  ;;  %v1097_v34 = vor.u32 %v1334_v27, %v1094_v28 }
  0x16   : > { %314 = vmatpush.bf16.msra.mxu1 %v1113_v18  ;;  %343 = vmatpush.bf16.msra.mxu2 %v1117_v22  ;;  %v1101_v35 = vor.u32 %v1337_v31, %v1100_v29  ;;  %v1076_v36 = vld [vmem:[#allocation5 + $0x80] sm:$0xf]  ;;  %v1332_v37 = vld [vmem:[#allocation5 + $0x8c] sm:$0xf0]  ;;  %v1330_v38 = vld [vmem:[#allocation5 + $0x84] sm:$0xf]  ;;  %v1105_v39 = vor.u32 %v1335_v32, %v1102_v33 }
  0x17   : > { %372 = vmatpush.bf16.msra.mxu3 %v1121_v26  ;;  %v1078_v40 = vld [vmem:[#allocation5 + $0x90] sm:$0xf0]  ;;  %v1084_v41 = vld [vmem:[#allocation5 + $0x88] sm:$0xf]  ;;  %v1333_v42 = vld [vmem:[#allocation5 + $0x94] sm:$0xf0]  ;;  %v1077_v45 = vor.u32 %v1332_v37, %v1076_v36 }
  0x18   : > { %v1331_v43 = vld [vmem:[#allocation5 + $0x8c] sm:$0xf]  ;;  %v1086_v44 = vld [vmem:[#allocation5 + $0x98] sm:$0xf0]  ;;  %v1081_v46 = vor.u32 %v1330_v38, %v1078_v40  ;;  %v1085_v47 = vor.u32 %v1333_v42, %v1084_v41  ;;  %v1060_v48 = vld [vmem:[#allocation5 + $0x60] sm:$0xf] }
  0x19   : > { %286 = vmatpush.bf16.msra.mxu0 %v1093_v30  ;;  %v1328_v49 = vld [vmem:[#allocation5 + $0x6c] sm:$0xf0]  ;;  %v1326_v50 = vld [vmem:[#allocation5 + $0x64] sm:$0xf]  ;;  %v1089_v51 = vor.u32 %v1331_v43, %v1086_v44  ;;  %v1062_v52 = vld [vmem:[#allocation5 + $0x70] sm:$0xf0] }
  0x1a   : > { %315 = vmatpush.bf16.msra.mxu1 %v1097_v34  ;;  %344 = vmatpush.bf16.msra.mxu2 %v1101_v35  ;;  %v1068_v53 = vld [vmem:[#allocation5 + $0x68] sm:$0xf]  ;;  %v1329_v54 = vld [vmem:[#allocation5 + $0x74] sm:$0xf0]  ;;  %v1327_v55 = vld [vmem:[#allocation5 + $0x6c] sm:$0xf]  ;;  %v1061_v57 = vor.u32 %v1328_v49, %v1060_v48  ;;  %v1065_v58 = vor.u32 %v1326_v50, %v1062_v52 }
  0x1b   : > { %373 = vmatpush.bf16.msra.mxu3 %v1105_v39  ;;  %v1070_v56 = vld [vmem:[#allocation5 + $0x78] sm:$0xf0]  ;;  %v1069_v59 = vor.u32 %v1329_v54, %v1068_v53  ;;  %v1044_v60 = vld [vmem:[#allocation5 + $0x40] sm:$0xf]  ;;  %v1324_v61 = vld [vmem:[#allocation5 + $0x4c] sm:$0xf0] }
  0x1c   : > { %v1322_v62 = vld [vmem:[#allocation5 + $0x44] sm:$0xf]  ;;  %v1073_v63 = vor.u32 %v1327_v55, %v1070_v56  ;;  %v1046_v0 = vld [vmem:[#allocation5 + $0x50] sm:$0xf0]  ;;  %v1052_v1 = vld [vmem:[#allocation5 + $0x48] sm:$0xf]  ;;  %v1045_v5 = vor.u32 %v1324_v61, %v1044_v60 }
  0x1d   : > { %287 = vmatpush.bf16.msra.mxu0 %v1077_v45  ;;  %v1325_v2 = vld [vmem:[#allocation5 + $0x54] sm:$0xf0]  ;;  %v1323_v3 = vld [vmem:[#allocation5 + $0x4c] sm:$0xf]  ;;  %v1054_v4 = vld [vmem:[#allocation5 + $0x58] sm:$0xf0]  ;;  %v1049_v7 = vor.u32 %v1322_v62, %v1046_v0 }
  0x1e   : > { %316 = vmatpush.bf16.msra.mxu1 %v1081_v46  ;;  %345 = vmatpush.bf16.msra.mxu2 %v1085_v47  ;;  %v1028_v6 = vld [vmem:[#allocation5 + $0x20] sm:$0xf]  ;;  %v1053_v8 = vor.u32 %v1325_v2, %v1052_v1  ;;  %v1320_v9 = vld [vmem:[#allocation5 + $0x2c] sm:$0xf0]  ;;  %v1318_v10 = vld [vmem:[#allocation5 + $0x24] sm:$0xf]  ;;  %v1057_v12 = vor.u32 %v1323_v3, %v1054_v4 }
  0x1f   : > { %374 = vmatpush.bf16.msra.mxu3 %v1089_v51  ;;  %v1030_v11 = vld [vmem:[#allocation5 + $0x30] sm:$0xf0]  ;;  %v1036_v13 = vld [vmem:[#allocation5 + $0x28] sm:$0xf]  ;;  %v1321_v14 = vld [vmem:[#allocation5 + $0x34] sm:$0xf0]  ;;  %v1029_v17 = vor.u32 %v1320_v9, %v1028_v6 }
  0x20   : > { %s1313_s2 = sshll.u32 %s1545_s1, 6  ;;  %v1319_v15 = vld [vmem:[#allocation5 + $0x2c] sm:$0xf]  ;;  %v1038_v16 = vld [vmem:[#allocation5 + $0x38] sm:$0xf0]  ;;  %v1033_v18 = vor.u32 %v1318_v10, %v1030_v11  ;;  %v1037_v19 = vor.u32 %v1321_v14, %v1036_v13  ;;  %s1347_s14 = sshll.u32 %s1545_s1, 8 }
  0x21   : > { %288 = vmatpush.bf16.msra.mxu0 %v1061_v57  ;;  %v1012_v20 = vld [vmem:[#allocation5] sm:$0xf]  ;;  %v1316_v21 = vld [vmem:[#allocation5 + $0xc] sm:$0xf0]  ;;  %v1314_v22 = vld [vmem:[#allocation5 + $0x4] sm:$0xf]  ;;  %s1614_s11 = scalar_lea.vmem %s2092_s0, %s1313_s2  ;;  %v1041_v23 = vor.u32 %v1319_v15, %v1038_v16 }
  0x22   : > { %317 = vmatpush.bf16.msra.mxu1 %v1065_v58  ;;  %346 = vmatpush.bf16.msra.mxu2 %v1069_v59  ;;  %v1014_v24 = vld [vmem:[#allocation5 + $0x10] sm:$0xf0]  ;;  %v1020_v25 = vld [vmem:[#allocation5 + $0x8] sm:$0xf]  ;;  %v1317_v26 = vld [vmem:[#allocation5 + $0x14] sm:$0xf0]  ;;  %v1013_v29 = vor.u32 %v1316_v21, %v1012_v20 }
  0x23   : > { %375 = vmatpush.bf16.msra.mxu3 %v1073_v63  ;;  %v1315_v27 = vld [vmem:[#allocation5 + $0xc] sm:$0xf]  ;;  %v1022_v28 = vld [vmem:[#allocation5 + $0x18] sm:$0xf0]  ;;  %v70_v30 = vld [vmem:[%s1614_s11] sm:$0xff]  ;;  %v1017_v32 = vor.u32 %v1314_v22, %v1014_v24  ;;  %v1021_v33 = vor.u32 %v1317_v26, %v1020_v25  ;;  %s1634_s15 = scalar_lea.vmem [#allocation4], %s1347_s14 }
  0x24   : > { %v71_v31 = vld [vmem:[%s1614_s11 + $0x8] sm:$0xff]  ;;  %v1025_v34 = vor.u32 %v1315_v27, %v1022_v28  ;;  %v72_v36 = vld [vmem:[%s1614_s11 + $0x10] sm:$0xff]  ;;  %v73_v37 = vld [vmem:[%s1614_s11 + $0x18] sm:$0xff]  ;;  %s66_s1 = sadd.s32 1, %s1545_s1  }
  0x25   : > { %289 = vmatpush.bf16.msra.mxu0 %v1045_v5  ;;  %v78_v35 = vpack.c.bf16 %v71_v31, %v70_v30  ;;  %v79_v38 = vpack.c.bf16 %v73_v37, %v72_v36  ;;  %v74_v39 = vld [vmem:[%s1614_s11 + $0x20] sm:$0xff]  ;;  %v75_v40 = vld [vmem:[%s1614_s11 + $0x28] sm:$0xff]  ;;  %v76_v42 = vld [vmem:[%s1614_s11 + $0x30] sm:$0xff]  ;;  %p63_p0 = scmp.ge.s32.totalorder %s66_s1, 2  }
  0x26   : > { %318 = vmatpush.bf16.msra.mxu1 %v1049_v7  ;;  %347 = vmatpush.bf16.msra.mxu2 %v1053_v8  ;;  %v80_v41 = vpack.c.bf16 %v75_v40, %v74_v39  ;;  %v77_v43 = vld [vmem:[%s1614_s11 + $0x38] sm:$0xff]  ;;  %v114_v45 = vld [vmem:[%s2095_s3] sm:$0xf]  ;;  %s1837_s0 = smov (%p63_p0), 0  }
  0x27   : > { %376 = vmatpush.bf16.msra.mxu3 %v1057_v12  ;;  %v81_v44 = vpack.c.bf16 %v77_v43, %v76_v42  ;;  %v1627_v46 = vperm.slane %v114_v45, 0  ;;  %v1630_v47 = vperm.slane %v114_v45, 1  ;;  %v1638_v52 = vperm.slane %v114_v45, 2 }
  0x28   : > { %v1640_v53 = vperm.slane %v114_v45, 3 }
  0x29   : > { %290 = vmatpush.bf16.msra.mxu0 %v1029_v17 }
  0x2a   : > { %319 = vmatpush.bf16.msra.mxu1 %v1033_v18  ;;  %348 = vmatpush.bf16.msra.mxu2 %v1037_v19 }
  0x2b   : > { %377 = vmatpush.bf16.msra.mxu3 %v1041_v23 }
  0x2d   : > { %291 = vmatpush.bf16.msra.mxu0 %v1013_v29 }
  0x2e   : > { %320 = vmatpush.bf16.msra.mxu1 %v1017_v32  ;;  %349 = vmatpush.bf16.msra.mxu2 %v1021_v33 }
  0x2f   : > { %378 = vmatpush.bf16.msra.mxu3 %v1025_v34 }
  0x30   : > { %292 = vmatmul.bf16.vlgmr.msra.gmra.mxu0 %v78_v35 }
  0x31   : > { %321 = vmatmul.bf16.vlgmr.msra.gmra.mxu1 %v78_v35  ;;  %350 = vmatmul.bf16.vlgmr.msra.gmra.mxu2 %v78_v35 }
  0x32   : > { %379 = vmatmul.bf16.vlgmr.msra.gmra.mxu3 %v78_v35 }
  0x40   : > { %297 = vmatmul.bf16.gmra.mxu0 %v79_v38 }
  0x41   : > { %326 = vmatmul.bf16.gmra.mxu1 %v79_v38  ;;  %355 = vmatmul.bf16.gmra.mxu2 %v79_v38 }
  0x42   : > { %384 = vmatmul.bf16.gmra.mxu3 %v79_v38 }
  0x50   : > { %302 = vmatmul.bf16.gmra.mxu0 %v80_v41 }
  0x51   : > { %331 = vmatmul.bf16.gmra.mxu1 %v80_v41  ;;  %360 = vmatmul.bf16.gmra.mxu2 %v80_v41 }
  0x52   : > { %389 = vmatmul.bf16.gmra.mxu3 %v80_v41 }
  0x60   : > { %307 = vmatmul.bf16.gmra.mxu0 %v81_v44 }
  0x61   : > { %336 = vmatmul.bf16.gmra.mxu1 %v81_v44  ;;  %365 = vmatmul.bf16.gmra.mxu2 %v81_v44 }
  0x62   : > { %394 = vmatmul.bf16.gmra.mxu3 %v81_v44 }
  0xad   : > { %v293_v48 = vpop.f32.mrf.mxu0 }
  0xae   : > { %v294_v49 = vadd.f32 %v293_v48, %v1627_v46  ;;  %v322_v50 = vpop.f32.mrf.mxu1 }
  0xaf   : > { %v323_v51 = vadd.f32 %v322_v50, %v1630_v47 }
  0xb0   : > { %403 = vst [vmem:[%s1634_s15] sm:$0xff] %v294_v49 }
  0xb1   : > { %404 = vst [vmem:[%s1634_s15 + $0x8] sm:$0xff] %v323_v51 }
  0xb4   : > { %v351_v54 = vpop.f32.mrf.mxu2 }
  0xb5   : > { %v352_v55 = vadd.f32 %v351_v54, %v1638_v52  ;;  %v380_v56 = vpop.f32.mrf.mxu3  ;;  %v295_v57 = vpop.f32.mrf.mxu0  ;;  %v1709_v54 = vld [vmem:[#allocation7 + $0xc] sm:$0xf] (%p63_p0) }
  0xb6   : > { %v381_v58 = vadd.f32 %v380_v56, %v1640_v53  ;;  %v296_v59 = vadd.f32 %v295_v57, %v1627_v46  ;;  %v324_v60 = vpop.f32.mrf.mxu1  ;;  %2100 = vst [vmem:[#allocation12_spill] sm:$0xff] (%p63_p0), %v1709_v54  ;;  %v1715_v56 = vld [vmem:[#allocation7 + $0xc] sm:$0xf0] (%p63_p0)  ;;  %v1719_v57 = vld [vmem:[#allocation7 + $0x14] sm:$0xf0] (%p63_p0) }
  0xb7   : > { %405 = vst [vmem:[%s1634_s15 + $0x10] sm:$0xff] %v352_v55  ;;  %v325_v61 = vadd.f32 %v324_v60, %v1630_v47  ;;  %v1711_v55 = vld [vmem:[#allocation7 + $0x8] sm:$0xf] (%p63_p0)  ;;  %v1725_v60 = vld [vmem:[#allocation7 + $0x2c] sm:$0xf] (%p63_p0)  ;;  %v467_v54 = vld [vmem:[#allocation2] sm:$0xff] (%p63_p0)  }
  0xb8   : > { %406 = vst [vmem:[%s1634_s15 + $0x18] sm:$0xff] %v381_v58  ;;  %v1721_v58 = vld [vmem:[#allocation7 + $0x24] sm:$0xf] (%p63_p0) }
  0xb9   : > { %407 = vst [vmem:[%s1634_s15 + $0x20] sm:$0xff] %v296_v59  ;;  %v1723_v59 = vld [vmem:[#allocation7 + $0x20] sm:$0xf] (%p63_p0) }
  0xba   : > { %408 = vst [vmem:[%s1634_s15 + $0x28] sm:$0xff] %v325_v61  ;;  %v1727_v61 = vld [vmem:[#allocation7 + $0x28] sm:$0xf] (%p63_p0) }
  0xbb   :  { %2101 = vst [vmem:[#allocation13_spill] sm:$0xff] (%p63_p0), %v1711_v55 }
  0xbc   : > { %v353_v62 = vpop.f32.mrf.mxu2  ;;  %2104 = vst [vmem:[#allocation16_spill] sm:$0xff] (%p63_p0), %v1719_v57 }
  0xbd   : > { %v354_v63 = vadd.f32 %v353_v62, %v1638_v52  ;;  %v382_v0 = vpop.f32.mrf.mxu3  ;;  %v298_v1 = vpop.f32.mrf.mxu0  ;;  %v1729_v62 = vld [vmem:[#allocation7 + $0x30] sm:$0xf0] (%p63_p0) }
  0xbe   : > { %v383_v2 = vadd.f32 %v382_v0, %v1640_v53  ;;  %v299_v3 = vadd.f32 %v298_v1, %v1627_v46  ;;  %v327_v4 = vpop.f32.mrf.mxu1  ;;  %v1733_v0 = vld [vmem:[#allocation7 + $0x38] sm:$0xf0] (%p63_p0)  ;;  %v1735_v1 = vld [vmem:[#allocation7 + $0x34] sm:$0xf0] (%p63_p0) }
  0xbf   : > { %409 = vst [vmem:[%s1634_s15 + $0x30] sm:$0xff] %v354_v63  ;;  %v328_v5 = vadd.f32 %v327_v4, %v1630_v47  ;;  %v1731_v63 = vld [vmem:[#allocation7 + $0x2c] sm:$0xf0] (%p63_p0)  ;;  %v1741_v4 = vld [vmem:[#allocation7 + $0x4c] sm:$0xf] (%p63_p0) }
  0xc0   : > { %410 = vst [vmem:[%s1634_s15 + $0x38] sm:$0xff] %v383_v2  ;;  %v1737_v2 = vld [vmem:[#allocation7 + $0x44] sm:$0xf] (%p63_p0) }
  0xc1   : > { %411 = vst [vmem:[%s1634_s15 + $0x40] sm:$0xff] %v299_v3  ;;  %v1739_v3 = vld [vmem:[#allocation7 + $0x40] sm:$0xf] (%p63_p0) }
  0xc2   : > { %412 = vst [vmem:[%s1634_s15 + $0x48] sm:$0xff] %v328_v5  ;;  %v1743_v5 = vld [vmem:[#allocation7 + $0x48] sm:$0xf] (%p63_p0) }
  0xc3   :  { %2105 = vst [vmem:[#allocation17_spill] sm:$0xff] (%p63_p0), %v1735_v1 }
  0xc4   : > { %v356_v6 = vpop.f32.mrf.mxu2  ;;  %2106 = vst [vmem:[#allocation18_spill] sm:$0xff] (%p63_p0), %v1737_v2 }
  0xc5   : > { %v357_v7 = vadd.f32 %v356_v6, %v1638_v52  ;;  %v385_v8 = vpop.f32.mrf.mxu3  ;;  %v300_v9 = vpop.f32.mrf.mxu0  ;;  %2107 = vst [vmem:[#allocation19_spill] sm:$0xff] (%p63_p0), %v1739_v3  ;;  %v1745_v6 = vld [vmem:[#allocation7 + $0x50] sm:$0xf0] (%p63_p0) }
  0xc6   : > { %v386_v10 = vadd.f32 %v385_v8, %v1640_v53  ;;  %v301_v11 = vadd.f32 %v300_v9, %v1627_v46  ;;  %v329_v12 = vpop.f32.mrf.mxu1  ;;  %2108 = vst [vmem:[#allocation20_spill] sm:$0xff] (%p63_p0), %v1741_v4  ;;  %v1749_v8 = vld [vmem:[#allocation7 + $0x58] sm:$0xf0] (%p63_p0)  ;;  %v1751_v9 = vld [vmem:[#allocation7 + $0x54] sm:$0xf0] (%p63_p0) }
  0xc7   : > { %413 = vst [vmem:[%s1634_s15 + $0x50] sm:$0xff] %v357_v7  ;;  %v330_v13 = vadd.f32 %v329_v12, %v1630_v47  ;;  %v1747_v7 = vld [vmem:[#allocation7 + $0x4c] sm:$0xf0] (%p63_p0)  ;;  %v1757_v12 = vld [vmem:[#allocation7 + $0x6c] sm:$0xf] (%p63_p0) }
  0xc8   : > { %414 = vst [vmem:[%s1634_s15 + $0x58] sm:$0xff] %v386_v10  ;;  %v1753_v10 = vld [vmem:[#allocation7 + $0x64] sm:$0xf] (%p63_p0) }
  0xc9   : > { %415 = vst [vmem:[%s1634_s15 + $0x60] sm:$0xff] %v301_v11  ;;  %v1755_v11 = vld [vmem:[#allocation7 + $0x60] sm:$0xf] (%p63_p0) }
  0xca   : > { %416 = vst [vmem:[%s1634_s15 + $0x68] sm:$0xff] %v330_v13  ;;  %v1759_v13 = vld [vmem:[#allocation7 + $0x68] sm:$0xf] (%p63_p0) }
  0xcb   :  { %2109 = vst [vmem:[#allocation21_spill] sm:$0xff] (%p63_p0), %v1743_v5 }
  0xcc   : > { %v358_v14 = vpop.f32.mrf.mxu2  ;;  %2110 = vst [vmem:[#allocation22_spill] sm:$0xff] (%p63_p0), %v1745_v6 }
  0xcd   : > { %v359_v15 = vadd.f32 %v358_v14, %v1638_v52  ;;  %v387_v16 = vpop.f32.mrf.mxu3  ;;  %v303_v17 = vpop.f32.mrf.mxu0  ;;  %2111 = vst [vmem:[#allocation23_spill] sm:$0xff] (%p63_p0), %v1747_v7  ;;  %v1761_v14 = vld [vmem:[#allocation7 + $0x70] sm:$0xf0] (%p63_p0) }
  0xce   : > { %v388_v18 = vadd.f32 %v387_v16, %v1640_v53  ;;  %v304_v19 = vadd.f32 %v303_v17, %v1627_v46  ;;  %v332_v20 = vpop.f32.mrf.mxu1  ;;  %2112 = vst [vmem:[#allocation24_spill] sm:$0xff] (%p63_p0), %v1749_v8  ;;  %v1765_v16 = vld [vmem:[#allocation7 + $0x78] sm:$0xf0] (%p63_p0)  ;;  %v1767_v17 = vld [vmem:[#allocation7 + $0x74] sm:$0xf0] (%p63_p0) }
  0xcf   : > { %417 = vst [vmem:[%s1634_s15 + $0x70] sm:$0xff] %v359_v15  ;;  %v333_v21 = vadd.f32 %v332_v20, %v1630_v47  ;;  %v1763_v15 = vld [vmem:[#allocation7 + $0x6c] sm:$0xf0] (%p63_p0)  ;;  %v1773_v20 = vld [vmem:[#allocation7 + $0x8c] sm:$0xf] (%p63_p0) }
  0xd0   : > { %418 = vst [vmem:[%s1634_s15 + $0x78] sm:$0xff] %v388_v18  ;;  %v1769_v18 = vld [vmem:[#allocation7 + $0x84] sm:$0xf] (%p63_p0) }
  0xd1   : > { %419 = vst [vmem:[%s1634_s15 + $0x80] sm:$0xff] %v304_v19  ;;  %v1771_v19 = vld [vmem:[#allocation7 + $0x80] sm:$0xf] (%p63_p0) }
  0xd2   : > { %420 = vst [vmem:[%s1634_s15 + $0x88] sm:$0xff] %v333_v21  ;;  %v1775_v21 = vld [vmem:[#allocation7 + $0x88] sm:$0xf] (%p63_p0) }
  0xd3   :  { %2113 = vst [vmem:[#allocation25_spill] sm:$0xff] (%p63_p0), %v1751_v9 }
  0xd4   : > { %v361_v22 = vpop.f32.mrf.mxu2  ;;  %2114 = vst [vmem:[#allocation26_spill] sm:$0xff] (%p63_p0), %v1753_v10 }
  0xd5   : > { %v362_v23 = vadd.f32 %v361_v22, %v1638_v52  ;;  %v390_v24 = vpop.f32.mrf.mxu3  ;;  %v305_v25 = vpop.f32.mrf.mxu0  ;;  %2115 = vst [vmem:[#allocation27_spill] sm:$0xff] (%p63_p0), %v1755_v11  ;;  %v1777_v22 = vld [vmem:[#allocation7 + $0x90] sm:$0xf0] (%p63_p0) }
  0xd6   : > { %v391_v26 = vadd.f32 %v390_v24, %v1640_v53  ;;  %v306_v27 = vadd.f32 %v305_v25, %v1627_v46  ;;  %v334_v28 = vpop.f32.mrf.mxu1  ;;  %2116 = vst [vmem:[#allocation28_spill] sm:$0xff] (%p63_p0), %v1757_v12  ;;  %v1781_v24 = vld [vmem:[#allocation7 + $0x98] sm:$0xf0] (%p63_p0)  ;;  %v1783_v25 = vld [vmem:[#allocation7 + $0x94] sm:$0xf0] (%p63_p0) }
  0xd7   : > { %421 = vst [vmem:[%s1634_s15 + $0x90] sm:$0xff] %v362_v23  ;;  %v335_v29 = vadd.f32 %v334_v28, %v1630_v47  ;;  %v1779_v23 = vld [vmem:[#allocation7 + $0x8c] sm:$0xf0] (%p63_p0)  ;;  %v1789_v28 = vld [vmem:[#allocation7 + $0xac] sm:$0xf] (%p63_p0) }
  0xd8   : > { %422 = vst [vmem:[%s1634_s15 + $0x98] sm:$0xff] %v391_v26  ;;  %v1785_v26 = vld [vmem:[#allocation7 + $0xa4] sm:$0xf] (%p63_p0) }
  0xd9   : > { %423 = vst [vmem:[%s1634_s15 + $0xa0] sm:$0xff] %v306_v27  ;;  %v1787_v27 = vld [vmem:[#allocation7 + $0xa0] sm:$0xf] (%p63_p0) }
  0xda   : > { %424 = vst [vmem:[%s1634_s15 + $0xa8] sm:$0xff] %v335_v29  ;;  %v1791_v29 = vld [vmem:[#allocation7 + $0xa8] sm:$0xf] (%p63_p0) }
  0xdb   :  { %2117 = vst [vmem:[#allocation29_spill] sm:$0xff] (%p63_p0), %v1759_v13 }
  0xdc   : > { %v363_v30 = vpop.f32.mrf.mxu2  ;;  %2118 = vst [vmem:[#allocation30_spill] sm:$0xff] (%p63_p0), %v1761_v14 }
  0xdd   : > { %v364_v31 = vadd.f32 %v363_v30, %v1638_v52  ;;  %v392_v32 = vpop.f32.mrf.mxu3  ;;  %v308_v33 = vpop.f32.mrf.mxu0  ;;  %2119 = vst [vmem:[#allocation31_spill] sm:$0xff] (%p63_p0), %v1763_v15  ;;  %v1793_v30 = vld [vmem:[#allocation7 + $0xb0] sm:$0xf0] (%p63_p0) }
  0xde   : > { %v393_v34 = vadd.f32 %v392_v32, %v1640_v53  ;;  %v309_v35 = vadd.f32 %v308_v33, %v1627_v46  ;;  %v337_v36 = vpop.f32.mrf.mxu1  ;;  %2120 = vst [vmem:[#allocation32_spill] sm:$0xff] (%p63_p0), %v1765_v16  ;;  %v1797_v32 = vld [vmem:[#allocation7 + $0xb8] sm:$0xf0] (%p63_p0)  ;;  %v1799_v33 = vld [vmem:[#allocation7 + $0xb4] sm:$0xf0] (%p63_p0) }
  0xdf   : > { %425 = vst [vmem:[%s1634_s15 + $0xb0] sm:$0xff] %v364_v31  ;;  %v338_v37 = vadd.f32 %v337_v36, %v1630_v47  ;;  %v1795_v31 = vld [vmem:[#allocation7 + $0xac] sm:$0xf0] (%p63_p0)  ;;  %v1805_v36 = vld [vmem:[#allocation7 + $0xcc] sm:$0xf] (%p63_p0) }
  0xe0   : > { %426 = vst [vmem:[%s1634_s15 + $0xb8] sm:$0xff] %v393_v34  ;;  %v1801_v34 = vld [vmem:[#allocation7 + $0xc4] sm:$0xf] (%p63_p0) }
  0xe1   : > { %427 = vst [vmem:[%s1634_s15 + $0xc0] sm:$0xff] %v309_v35  ;;  %v1803_v35 = vld [vmem:[#allocation7 + $0xc0] sm:$0xf] (%p63_p0) }
  0xe2   : > { %428 = vst [vmem:[%s1634_s15 + $0xc8] sm:$0xff] %v338_v37  ;;  %v1807_v37 = vld [vmem:[#allocation7 + $0xc8] sm:$0xf] (%p63_p0) }
  0xe3   :  { %2121 = vst [vmem:[#allocation33_spill] sm:$0xff] (%p63_p0), %v1767_v17 }
  0xe4   : > { %v366_v38 = vpop.f32.mrf.mxu2  ;;  %2122 = vst [vmem:[#allocation34_spill] sm:$0xff] (%p63_p0), %v1769_v18 }
  0xe5   : > { %v367_v39 = vadd.f32 %v366_v38, %v1638_v52  ;;  %v395_v40 = vpop.f32.mrf.mxu3  ;;  %v310_v41 = vpop.f32.mrf.mxu0  ;;  %2123 = vst [vmem:[#allocation35_spill] sm:$0xff] (%p63_p0), %v1771_v19  ;;  %v1809_v38 = vld [vmem:[#allocation7 + $0xd0] sm:$0xf0] (%p63_p0) }
  0xe6   : > { %v396_v42 = vadd.f32 %v395_v40, %v1640_v53  ;;  %v311_v43 = vadd.f32 %v310_v41, %v1627_v46  ;;  %v339_v44 = vpop.f32.mrf.mxu1  ;;  %v1705_v46 = vld [vmem:[#allocation7 + $0x4] sm:$0xf] (%p63_p0)  ;;  %2124 = vst [vmem:[#allocation36_spill] sm:$0xff] (%p63_p0), %v1773_v20  ;;  %v1813_v40 = vld [vmem:[#allocation7 + $0xd8] sm:$0xf0] (%p63_p0) }
  0xe7   : > { %429 = vst [vmem:[%s1634_s15 + $0xd0] sm:$0xff] %v367_v39  ;;  %v340_v45 = vadd.f32 %v339_v44, %v1630_v47  ;;  %v1707_v47 = vld [vmem:[#allocation7] sm:$0xf] (%p63_p0)  ;;  %v1811_v39 = vld [vmem:[#allocation7 + $0xcc] sm:$0xf0] (%p63_p0) }
  0xe8   : > { %430 = vst [vmem:[%s1634_s15 + $0xd8] sm:$0xff] %v396_v42  ;;  %v1815_v41 = vld [vmem:[#allocation7 + $0xd4] sm:$0xf0] (%p63_p0)  ;;  %v1817_v42 = vld [vmem:[#allocation7 + $0xe4] sm:$0xf] (%p63_p0) }
  0xe9   : > { %431 = vst [vmem:[%s1634_s15 + $0xe0] sm:$0xff] %v311_v43  ;;  %v1819_v43 = vld [vmem:[#allocation7 + $0xe0] sm:$0xf] (%p63_p0)  ;;  %v1821_v44 = vld [vmem:[#allocation7 + $0xec] sm:$0xf] (%p63_p0) }
  0xea   : > { %432 = vst [vmem:[%s1634_s15 + $0xe8] sm:$0xff] %v340_v45  ;;  %v1823_v45 = vld [vmem:[#allocation7 + $0xe8] sm:$0xf] (%p63_p0) }
  0xeb   :  { %2099 = vst [vmem:[#allocation11_spill] sm:$0xff] (%p63_p0), %v1705_v46 }
  0xec   : > { %v368_v48 = vpop.f32.mrf.mxu2  ;;  %65 = sbr.rel (!%p63_p0) target bundleno = 14 (0xe), region = 77  ;;  %2125 = vst [vmem:[#allocation37_spill] sm:$0xff] (%p63_p0), %v1775_v21 }
  0xed   : > { %v369_v49 = vadd.f32 %v368_v48, %v1638_v52  ;;  %v397_v50 = vpop.f32.mrf.mxu3  ;;  %v1713_v52 = vld [vmem:[#allocation7 + $0x10] sm:$0xf0] (%p63_p0)  ;;  %2126 = vst [vmem:[#allocation38_spill] sm:$0xff] (%p63_p0), %v1785_v26 }
  0xee   : > { %v398_v51 = vadd.f32 %v397_v50, %v1640_v53  ;;  %2102 = vst [vmem:[#allocation14_spill] sm:$0xff] (%p63_p0), %v1713_v52  ;;  %v1717_v53 = vld [vmem:[#allocation7 + $0x18] sm:$0xf0] (%p63_p0)  ;;  %v1825_v48 = vld [vmem:[#allocation7 + $0xf0] sm:$0xf0] (%p63_p0) }
  0xef   : > { %433 = vst [vmem:[%s1634_s15 + $0xf0] sm:$0xff] %v369_v49  ;;  %v1827_v49 = vld [vmem:[#allocation7 + $0xec] sm:$0xf0] (%p63_p0)  ;;  %v1829_v50 = vld [vmem:[#allocation7 + $0xf8] sm:$0xf0] (%p63_p0) }
  0xf0   : > { %434 = vst [vmem:[%s1634_s15 + $0xf8] sm:$0xff] %v398_v51  ;;  %v1831_v51 = vld [vmem:[#allocation7 + $0xf4] sm:$0xf0] (%p63_p0) }
  0xf1   :  { %2103 = vst [vmem:[#allocation15_spill] sm:$0xff] %v1717_v53  ;;  %v468_v53 = vld [vmem:[#allocation3] sm:$0xff]  }
  0xf2   :  { %2127 = vst [vmem:[#allocation39_spill] sm:$0xff] %v1787_v27 }
  0xf3   :  { %2128 = vst [vmem:[#allocation40_spill] sm:$0xff] %v1789_v28 }
  0xf4   :  { %2129 = vst [vmem:[#allocation41_spill] sm:$0xff] %v1791_v29 }
  0xf5   :  { %2130 = vst [vmem:[#allocation42_spill] sm:$0xff] %v1793_v30 }
  0xf6   :  { %2131 = vst [vmem:[#allocation43_spill] sm:$0xff] %v1801_v34 }
  0xf7   :  { %2132 = vst [vmem:[#allocation44_spill] sm:$0xff] %v1803_v35 }
  0xf8   :  { %2133 = vst [vmem:[#allocation45_spill] sm:$0xff] %v1805_v36 }
  0xf9   :  { %2134 = vst [vmem:[#allocation46_spill] sm:$0xff] %v1807_v37 }
  0xfa   :  { %2135 = vst [vmem:[#allocation47_spill] sm:$0xff] %v1809_v38 }
  0xfb   :  { %2136 = vst [vmem:[#allocation48_spill] sm:$0xff] %v1817_v42 }
  0xfc   :  { %2137 = vst [vmem:[#allocation49_spill] sm:$0xff] %v1819_v43 }
  0xfd   :  { %2138 = vst [vmem:[#allocation50_spill] sm:$0xff] %v1821_v44 }
  0xfe   :  { %2139 = vst [vmem:[#allocation51_spill] sm:$0xff] %v1823_v45 }
  0xff LB: > { %v2144_v35 = vld [vmem:[#allocation44_spill] sm:$0xff]  ;;  %v2146_v34 = vld [vmem:[#allocation43_spill] sm:$0xff]  ;;  %v2148_v36 = vld [vmem:[#allocation45_spill] sm:$0xff]  ;;  %s1381_s3 = sshll.u32 %s1557_s0, 6  ;;  %s1382_s17 = sshll.u32 %s1557_s0, 4  ;;  %s1557_s0 = sphi %s1837_s0, %s474_s0   ;;  %v1553_v54 = vphi %v467_v54, %v2182_v54   ;;  %v1549_v53 = vphi %v468_v53, %v2181_v53  }
 0x100   : > { %v2147_v37 = vld [vmem:[#allocation46_spill] sm:$0xff]  ;;  %v2149_v27 = vld [vmem:[#allocation39_spill] sm:$0xff]  ;;  %v2152_v29 = vld [vmem:[#allocation41_spill] sm:$0xff]  ;;  %s1943_s16 = scalar_lea.vmem [#allocation4], %s1381_s3  ;;  %s1954_s20 = scalar_lea.vmem %s2098_s6, %s1382_s17 }
 0x101   : > { %v2145_v38 = vld [vmem:[#allocation47_spill] sm:$0xff]  ;;  %v2150_v30 = vld [vmem:[#allocation42_spill] sm:$0xff]  ;;  %v2153_v28 = vld [vmem:[#allocation40_spill] sm:$0xff]  ;;  %s474_s0 = sadd.s32 1, %s1557_s0  }
 0x102   : > { %v2141_v42 = vld [vmem:[#allocation48_spill] sm:$0xff]  ;;  %v2151_v26 = vld [vmem:[#allocation38_spill] sm:$0xff]  ;;  %v2154_v19 = vld [vmem:[#allocation35_spill] sm:$0xff]  ;;  %p471_p1 = scmp.ge.s32.totalorder %s474_s0, 8  }
 0x103   : > { %v2140_v43 = vld [vmem:[#allocation49_spill] sm:$0xff]  ;;  %v1852_v55 = vor.u32 %v2141_v42, %v1825_v48  ;;  %v1870_v42 = vor.u32 %v2146_v34, %v2145_v38  ;;  %v1226_v34 = vor.u32 %v1795_v31, %v2149_v27  ;;  %v1210_v38 = vor.u32 %v1779_v23, %v2154_v19  ;;  %v2155_v18 = vld [vmem:[#allocation34_spill] sm:$0xff]  ;;  %v2157_v20 = vld [vmem:[#allocation36_spill] sm:$0xff] }
 0x104   : > { %v1848_v57 = vor.u32 %v1827_v49, %v2140_v43  ;;  %v2143_v44 = vld [vmem:[#allocation50_spill] sm:$0xff]  ;;  %v1866_v43 = vor.u32 %v1811_v39, %v2144_v35  ;;  %v1230_v35 = vor.u32 %v2151_v26, %v2150_v30  ;;  %v1214_v27 = vor.u32 %v2155_v18, %v1777_v22  ;;  %v2156_v21 = vld [vmem:[#allocation37_spill] sm:$0xff]  ;;  %v2158_v11 = vld [vmem:[#allocation27_spill] sm:$0xff] }
 0x105   : > { %v2142_v45 = vld [vmem:[#allocation51_spill] sm:$0xff]  ;;  %v1860_v52 = vor.u32 %v2143_v44, %v1829_v50  ;;  %659 = vmatpush.bf16.msra.mxu1 %v1852_v55  ;;  %v1876_v44 = vor.u32 %v1815_v41, %v2147_v37  ;;  %v1234_v37 = vor.u32 %v1799_v33, %v2152_v29  ;;  %v1218_v26 = vor.u32 %v1783_v25, %v2156_v21  ;;  %v2160_v14 = vld [vmem:[#allocation30_spill] sm:$0xff]  ;;  %v2162_v13 = vld [vmem:[#allocation29_spill] sm:$0xff] }
 0x106   : > { %v1856_v46 = vor.u32 %v1831_v51, %v2142_v45  ;;  %646 = vmatpush.bf16.msra.mxu0 %v1848_v57  ;;  %v1880_v45 = vor.u32 %v2148_v36, %v1813_v40  ;;  %v1238_v36 = vor.u32 %v2153_v28, %v1797_v32  ;;  %v1222_v30 = vor.u32 %v2157_v20, %v1781_v24  ;;  %v2159_v15 = vld [vmem:[#allocation31_spill] sm:$0xff]  ;;  %v2161_v10 = vld [vmem:[#allocation26_spill] sm:$0xff]  ;;  %v2163_v17 = vld [vmem:[#allocation33_spill] sm:$0xff] }
 0x107   : > { %685 = vmatpush.bf16.msra.mxu3 %v1860_v52  ;;  %v1194_v28 = vor.u32 %v2159_v15, %v2158_v11  ;;  %v1198_v29 = vor.u32 %v2161_v10, %v2160_v14  ;;  %v1202_v18 = vor.u32 %v2163_v17, %v2162_v13  ;;  %v2164_v16 = vld [vmem:[#allocation32_spill] sm:$0xff]  ;;  %v2166_v3 = vld [vmem:[#allocation19_spill] sm:$0xff]  ;;  %v2168_v6 = vld [vmem:[#allocation22_spill] sm:$0xff]  ;;  %v1166_v13 = vor.u32 %v1721_v58, %v1729_v62 }
 0x108   : > { %672 = vmatpush.bf16.msra.mxu2 %v1856_v46  ;;  %v2165_v12 = vld [vmem:[#allocation28_spill] sm:$0xff]  ;;  %v2167_v7 = vld [vmem:[#allocation23_spill] sm:$0xff]  ;;  %v2169_v2 = vld [vmem:[#allocation18_spill] sm:$0xff] }
 0x109   : > { %660 = vmatpush.bf16.msra.mxu1 %v1870_v42  ;;  %v1206_v19 = vor.u32 %v2165_v12, %v2164_v16  ;;  %v1178_v20 = vor.u32 %v2167_v7, %v2166_v3  ;;  %v1182_v21 = vor.u32 %v2169_v2, %v2168_v6  ;;  %v2170_v5 = vld [vmem:[#allocation21_spill] sm:$0xff]  ;;  %v2172_v8 = vld [vmem:[#allocation24_spill] sm:$0xff]  ;;  %v1162_v12 = vor.u32 %v1731_v63, %v1723_v59  ;;  %v2176_v6 = vld [vmem:[#allocation11_spill] sm:$0xff] }
 0x10a   : > { %647 = vmatpush.bf16.msra.mxu0 %v1866_v43  ;;  %v2171_v9 = vld [vmem:[#allocation25_spill] sm:$0xff]  ;;  %v2173_v4 = vld [vmem:[#allocation20_spill] sm:$0xff]  ;;  %v1174_v3 = vor.u32 %v1725_v60, %v1733_v0  ;;  %v2179_v15 = vld [vmem:[#allocation15_spill] sm:$0xff] }
 0x10b   : > { %686 = vmatpush.bf16.msra.mxu3 %v1880_v45  ;;  %v1186_v10 = vor.u32 %v2171_v9, %v2170_v5  ;;  %v1190_v11 = vor.u32 %v2173_v4, %v2172_v8  ;;  %v2174_v1 = vld [vmem:[#allocation17_spill] sm:$0xff]  ;;  %v1146_v4 = vor.u32 %v1715_v56, %v1707_v47  ;;  %v2175_v5 = vld [vmem:[#allocation14_spill] sm:$0xff]  ;;  %v2178_v9 = vld [vmem:[#allocation16_spill] sm:$0xff] }
 0x10c   : > { %673 = vmatpush.bf16.msra.mxu2 %v1876_v44  ;;  %v1170_v2 = vor.u32 %v2174_v1, %v1727_v61  ;;  %v1150_v7 = vor.u32 %v2176_v6, %v2175_v5  ;;  %v2177_v8 = vld [vmem:[#allocation13_spill] sm:$0xff]  ;;  %v2180_v16 = vld [vmem:[#allocation12_spill] sm:$0xff]  ;;  %v485_v1 = vpack.c.bf16 %v1553_v54, %v1553_v54  ;;  %v482_v54 = vld [vmem:[%s1943_s16 + $0x8] sm:$0xff] }
 0x10d   : > { %661 = vmatpush.bf16.msra.mxu1 %v1230_v35  ;;  %v1154_v14 = vor.u32 %v2178_v9, %v2177_v8  ;;  %v1158_v17 = vor.u32 %v2180_v16, %v2179_v15  ;;  %v1389_v47 = vld [vmem:[%s2096_s4 + $0x20] sm:$0xff] (%p471_p1)  ;;  %v1388_v56 = vld [vmem:[%s2096_s4 + $0x18] sm:$0xff] (%p471_p1)  ;;  %v1387_v58 = vld [vmem:[%s2096_s4 + $0x10] sm:$0xff] (%p471_p1) }
 0x10e   : > { %648 = vmatpush.bf16.msra.mxu0 %v1226_v34  ;;  %v1386_v59 = vld [vmem:[%s2096_s4 + $0x8] sm:$0xff] (%p471_p1)  ;;  %v1385_v60 = vld [vmem:[%s2096_s4] sm:$0xff] (%p471_p1) }
 0x10f   : > { %687 = vmatpush.bf16.msra.mxu3 %v1238_v36 }
 0x110   : > { %674 = vmatpush.bf16.msra.mxu2 %v1234_v37 }
 0x111   : > { %662 = vmatpush.bf16.msra.mxu1 %v1214_v27 }
 0x112   : > { %649 = vmatpush.bf16.msra.mxu0 %v1210_v38 }
 0x113   : > { %688 = vmatpush.bf16.msra.mxu3 %v1222_v30 }
 0x114   : > { %675 = vmatpush.bf16.msra.mxu2 %v1218_v26 }
 0x115   : > { %663 = vmatpush.bf16.msra.mxu1 %v1198_v29 }
 0x116   : > { %650 = vmatpush.bf16.msra.mxu0 %v1194_v28 }
 0x117   : > { %689 = vmatpush.bf16.msra.mxu3 %v1206_v19 }
 0x118   : > { %676 = vmatpush.bf16.msra.mxu2 %v1202_v18 }
 0x119   : > { %664 = vmatpush.bf16.msra.mxu1 %v1182_v21 }
 0x11a   : > { %651 = vmatpush.bf16.msra.mxu0 %v1178_v20 }
 0x11b   : > { %690 = vmatpush.bf16.msra.mxu3 %v1190_v11 }
 0x11c   : > { %677 = vmatpush.bf16.msra.mxu2 %v1186_v10 }
 0x11d   : > { %665 = vmatpush.bf16.msra.mxu1 %v1166_v13 }
 0x11e   : > { %652 = vmatpush.bf16.msra.mxu0 %v1162_v12 }
 0x11f   : > { %691 = vmatpush.bf16.msra.mxu3 %v1174_v3 }
 0x120   : > { %678 = vmatpush.bf16.msra.mxu2 %v1170_v2 }
 0x121   : > { %666 = vmatpush.bf16.msra.mxu1 %v1150_v7 }
 0x122   : > { %653 = vmatpush.bf16.msra.mxu0 %v1146_v4 }
 0x123   : > { %692 = vmatpush.bf16.msra.mxu3 %v1158_v17 }
 0x124   : > { %679 = vmatpush.bf16.msra.mxu2 %v1154_v14  ;;  %667 = vmatmul.bf16.vlgmr.msra.gmra.mxu1 %v485_v1 }
 0x125   : > { %745 = vmatpush.bf16.msrb.mxu1 %v1852_v55  ;;  %654 = vmatmul.bf16.vlgmr.msra.gmra.mxu0 %v485_v1 }
 0x126   : > { %732 = vmatpush.bf16.msrb.mxu0 %v1848_v57  ;;  %693 = vmatmul.bf16.vlgmr.msra.gmra.mxu3 %v485_v1 }
 0x127   : > { %680 = vmatmul.bf16.vlgmr.msra.gmra.mxu2 %v485_v1  ;;  %771 = vmatpush.bf16.msrb.mxu3 %v1860_v52 }
 0x128   : > { %758 = vmatpush.bf16.msrb.mxu2 %v1856_v46  ;;  %v481_v46 = vld [vmem:[%s1943_s16] sm:$0xff] }
 0x129   : > { %746 = vmatpush.bf16.msrb.mxu1 %v1870_v42 }
 0x12a   : > { %733 = vmatpush.bf16.msrb.mxu0 %v1866_v43 }
 0x12b   : > { %772 = vmatpush.bf16.msrb.mxu3 %v1880_v45 }
 0x12c   : > { %759 = vmatpush.bf16.msrb.mxu2 %v1876_v44 }
 0x12d   : > { %747 = vmatpush.bf16.msrb.mxu1 %v1230_v35 }
 0x12e   : > { %734 = vmatpush.bf16.msrb.mxu0 %v1226_v34 }
 0x12f   : > { %773 = vmatpush.bf16.msrb.mxu3 %v1238_v36 }
 0x130   : > { %760 = vmatpush.bf16.msrb.mxu2 %v1234_v37  ;;  %v1274_v37 = vld [vmem:[%s1943_s16 + $0x20] sm:$0xff] }
 0x131   : > { %748 = vmatpush.bf16.msrb.mxu1 %v1214_v27 }
 0x132   : > { %735 = vmatpush.bf16.msrb.mxu0 %v1210_v38  ;;  %v1275_v38 = vld [vmem:[%s1943_s16 + $0x28] sm:$0xff] }
 0x133   : > { %774 = vmatpush.bf16.msrb.mxu3 %v1222_v30 }
 0x134   : > { %761 = vmatpush.bf16.msrb.mxu2 %v1218_v26 }
 0x135   : > { %749 = vmatpush.bf16.msrb.mxu1 %v1198_v29 }
 0x136   : > { %736 = vmatpush.bf16.msrb.mxu0 %v1194_v28 }
 0x137   : > { %775 = vmatpush.bf16.msrb.mxu3 %v1206_v19 }
 0x138   : > { %762 = vmatpush.bf16.msrb.mxu2 %v1202_v18 }
 0x139   : > { %750 = vmatpush.bf16.msrb.mxu1 %v1182_v21 }
 0x13a   : > { %737 = vmatpush.bf16.msrb.mxu0 %v1178_v20 }
 0x13b   : > { %776 = vmatpush.bf16.msrb.mxu3 %v1190_v11 }
 0x13c   : > { %763 = vmatpush.bf16.msrb.mxu2 %v1186_v10 }
 0x13d   : > { %751 = vmatpush.bf16.msrb.mxu1 %v1166_v13 }
 0x13e   : > { %738 = vmatpush.bf16.msrb.mxu0 %v1162_v12 }
 0x13f   : > { %777 = vmatpush.bf16.msrb.mxu3 %v1174_v3  ;;  %v483_v3 = vld [vmem:[%s1943_s16 + $0x10] sm:$0xff] }
 0x140   : > { %764 = vmatpush.bf16.msrb.mxu2 %v1170_v2 }
 0x141   : > { %752 = vmatpush.bf16.msrb.mxu1 %v1150_v7 }
 0x142   : > { %739 = vmatpush.bf16.msrb.mxu0 %v1146_v4  ;;  %v484_v4 = vld [vmem:[%s1943_s16 + $0x18] sm:$0xff] }
 0x143   : > { %778 = vmatpush.bf16.msrb.mxu3 %v1158_v17 }
 0x144   : > { %765 = vmatpush.bf16.msrb.mxu2 %v1154_v14 }
 0x1a1   : > { %v668_v52 = vpop.f32.mrf.mxu1 }
 0x1a2   : > { %v655_v55 = vpop.f32.mrf.mxu0  ;;  %v699_v1 = vadd.f32 %v668_v52, %v482_v54  ;;  %v1277_v52 = vld [vmem:[%s1943_s16 + $0x38] sm:$0xff] }
 0x1a3   : > { %v698_v57 = vadd.f32 %v655_v55, %v481_v46  ;;  %v1276_v55 = vld [vmem:[%s1943_s16 + $0x30] sm:$0xff] }
 0x1a4   : > { %v706_v2 = vmul.f32 0.5, %v699_v1 }
 0x1a5   : > { %v702_v5 = vmul.f32 0.5, %v698_v57 }
 0x1a7   : > { %1454 = vtanh.f32 %v702_v5 }
 0x1a8   : > { %1456 = vtanh.f32 %v706_v2 }
 0x1a9   : > { %v694_v7 = vpop.f32.mrf.mxu3  ;;  %v670_v11 = vpop.f32.mrf.mxu1 }
 0x1aa   : > { %v681_v6 = vpop.f32.mrf.mxu2  ;;  %v701_v9 = vadd.f32 %v694_v7, %v484_v4  ;;  %v657_v10 = vpop.f32.mrf.mxu0 }
 0x1ab   : > { %v700_v8 = vadd.f32 %v681_v6, %v483_v3 }
 0x1ac   : > { %v711_v12 = vmul.f32 0.5, %v701_v9 }
 0x1ad   : > { %1458 = vtanh.f32 %v700_v8  ;;  %v1455_v13 = vpop.eup %1454 }
 0x1ae   : > { %v1457_v14 = vpop.eup %1456  ;;  %v704_v15 = vmul.f32 0.5, %v1455_v13  ;;  %1460 = vtanh.f32 %v711_v12 }
 0x1af   : > { %v708_v16 = vmul.f32 0.5, %v1457_v14 }
 0x1b0   : > { %v705_v17 = vadd.f32 0.5, %v704_v15 }
 0x1b1   : > { %v709_v18 = vadd.f32 0.5, %v708_v16  ;;  %v696_v20 = vpop.f32.mrf.mxu3 }
 0x1b2   : > { %v683_v19 = vpop.f32.mrf.mxu2 }
 0x1b3   : > { %v1459_v21 = vpop.eup %1458  ;;  %v715_v26 = vmul.f32 %v1549_v53, %v709_v18 }
 0x1b4   : > { %v716_v27 = vmul.f32 %v1459_v21, %v705_v17  ;;  %v1461_v28 = vpop.eup %1460 }
 0x1b5   : > { %v713_v30 = vmul.f32 0.5, %v1461_v28  ;;  %v1392_v28 = vld [vmem:[%s2096_s4 + $0x38] sm:$0xff] (%p471_p1) }
 0x1b6   : > { %v717_v29 = vadd.f32 %v716_v27, %v715_v26  ;;  %905 = vmatpush.bf16.msra.mxu0 (%p471_p1), %v1392_v28  ;;  %1393 = vmatpush.bf16.msra.mxu1 (%p471_p1), %v1392_v28 }
 0x1b7   : > { %v714_v34 = vadd.f32 0.5, %v713_v30  ;;  %1394 = vmatpush.bf16.msra.mxu2 (%p471_p1), %v1392_v28  ;;  %1395 = vmatpush.bf16.msra.mxu3 (%p471_p1), %v1392_v28  ;;  %v1390_v30 = vld [vmem:[%s2096_s4 + $0x28] sm:$0xff] (%p471_p1) }
 0x1b8   : > { %1462 = vtanh.f32 %v717_v29 }
 0x1be   : > { %v1463_v35 = vpop.eup %1462 }
 0x1bf   : > { %v719_v36 = vmul.f32 %v1463_v35, %v714_v34 }
 0x1c1   : > { %722 = vst [vmem:[%s1954_s20] sm:$0xff] %v719_v36  ;;  %v731_v53 = vpack.c.bf16 %v719_v36, %v719_v36 }
 0x1c3   : > { %740 = vmatmul.bf16.vlgmr.msrb.gmra.mxu0 %v731_v53  ;;  %753 = vmatmul.bf16.vlgmr.msrb.gmra.mxu1 %v731_v53 }
 0x1c4   : > { %766 = vmatmul.bf16.vlgmr.msrb.gmra.mxu2 %v731_v53  ;;  %779 = vmatmul.bf16.vlgmr.msrb.gmra.mxu3 %v731_v53 }
 0x240   : > { %v741_v42 = vpop.f32.mrf.mxu0  ;;  %v754_v43 = vpop.f32.mrf.mxu1 }
 0x241   : > { %v784_v44 = vadd.f32 %v1274_v37, %v741_v42  ;;  %v785_v45 = vadd.f32 %v1275_v38, %v754_v43  ;;  %v1474_v42 = vld [vmem:[%s2097_s5] ss:$0 sm:$0xff] (%p471_p1) }
 0x243   : > { %v788_v46 = vmul.f32 0.5, %v784_v44  ;;  %v792_v54 = vmul.f32 0.5, %v785_v45 }
 0x245   : > { %1464 = vtanh.f32 %v788_v46 }
 0x246   : > { %1466 = vtanh.f32 %v792_v54 }
 0x247   : > { %v767_v57 = vpop.f32.mrf.mxu2  ;;  %v780_v1 = vpop.f32.mrf.mxu3 }
 0x248   : > { %v786_v5 = vadd.f32 %v1276_v55, %v767_v57  ;;  %v787_v2 = vadd.f32 %v1277_v52, %v780_v1  ;;  %v743_v3 = vpop.f32.mrf.mxu0  ;;  %v756_v4 = vpop.f32.mrf.mxu1 }
 0x24a   : > { %1468 = vtanh.f32 %v786_v5  ;;  %v797_v6 = vmul.f32 0.5, %v787_v2 }
 0x24b   : > { %v1465_v7 = vpop.eup %1464 }
 0x24c   : > { %v1467_v8 = vpop.eup %1466  ;;  %v790_v9 = vmul.f32 0.5, %v1465_v7  ;;  %1470 = vtanh.f32 %v797_v6 }
 0x24d   : > { %v794_v10 = vmul.f32 0.5, %v1467_v8 }
 0x24e   : > { %v791_v11 = vadd.f32 0.5, %v790_v9 }
 0x24f   : > { %v795_v12 = vadd.f32 0.5, %v794_v10  ;;  %v769_v13 = vpop.f32.mrf.mxu2  ;;  %v782_v14 = vpop.f32.mrf.mxu3 }
 0x250   : > { %v1469_v15 = vpop.eup %1468 }
 0x251   : > { %v801_v16 = vmul.f32 %v795_v12, %v717_v29  ;;  %v802_v17 = vmul.f32 %v1469_v15, %v791_v11  ;;  %v1391_v29 = vld [vmem:[%s2096_s4 + $0x30] sm:$0xff] (%p471_p1) }
 0x252   : > { %v1471_v18 = vpop.eup %1470  ;;  %906 = vmatpush.bf16.msra.mxu0 (%p471_p1), %v1391_v29  ;;  %1396 = vmatpush.bf16.msra.mxu1 (%p471_p1), %v1391_v29 }
 0x253   : > { %v803_v19 = vadd.f32 %v802_v17, %v801_v16   ;;  %v799_v20 = vmul.f32 0.5, %v1471_v18  ;;  %1397 = vmatpush.bf16.msra.mxu2 (%p471_p1), %v1391_v29  ;;  %1398 = vmatpush.bf16.msra.mxu3 (%p471_p1), %v1391_v29 }
 0x255   : > { %1472 = vtanh.f32 %v803_v19  ;;  %v800_v21 = vadd.f32 0.5, %v799_v20  ;;  %v2181_v53 = vmov %v803_v19  ;;  %810 = vst [vmem:[#allocation3] sm:$0xff] (%p471_p1), %v803_v19 }
 0x256   :  { %907 = vmatpush.bf16.msra.mxu0 (%p471_p1), %v1390_v30  ;;  %1399 = vmatpush.bf16.msra.mxu1 (%p471_p1), %v1390_v30 }
 0x257   :  { %1400 = vmatpush.bf16.msra.mxu2 (%p471_p1), %v1390_v30  ;;  %1401 = vmatpush.bf16.msra.mxu3 (%p471_p1), %v1390_v30 }
 0x25a   :  { %473 = sbr.rel (!%p471_p1) target bundleno = 255 (0xff), region = 88  ;;  %908 = vmatpush.bf16.msra.mxu0 (%p471_p1), %v1389_v47  ;;  %1402 = vmatpush.bf16.msra.mxu1 (%p471_p1), %v1389_v47 }
 0x25b   : > { %v1473_v26 = vpop.eup %1472  ;;  %1403 = vmatpush.bf16.msra.mxu2 (%p471_p1), %v1389_v47  ;;  %1404 = vmatpush.bf16.msra.mxu3 (%p471_p1), %v1389_v47 }
 0x25c   : > { %v805_v27 = vmul.f32 %v1473_v26, %v800_v21  }
 0x25e   : > { %1280 = vst [vmem:[%s1954_s20 + $0x8] sm:$0xff] %v805_v27  ;;  %v2182_v54 = vmov %v805_v27  ;;  %909 = vmatpush.bf16.msra.mxu0 (%p471_p1), %v1388_v56  ;;  %1405 = vmatpush.bf16.msra.mxu1 (%p471_p1), %v1388_v56 }
 0x25f   :  { %809 = vst [vmem:[#allocation2] sm:$0xff] %v805_v27  ;;  %1406 = vmatpush.bf16.msra.mxu2 %v1388_v56  ;;  %1407 = vmatpush.bf16.msra.mxu3 %v1388_v56 }
 0x262   :  { %910 = vmatpush.bf16.msra.mxu0 %v1387_v58  ;;  %1408 = vmatpush.bf16.msra.mxu1 %v1387_v58 }
 0x263   :  { %1409 = vmatpush.bf16.msra.mxu2 %v1387_v58  ;;  %1410 = vmatpush.bf16.msra.mxu3 %v1387_v58 }
 0x265   :  { %v813_v61 = vld [vmem:[%s2098_s6] sm:$0xff]  ;;  %v814_v62 = vld [vmem:[%s2098_s6 + $0x8] sm:$0xff]  ;;  %v815_v40 = vld [vmem:[%s2098_s6 + $0x10] sm:$0xff] }
 0x266   :  { %911 = vmatpush.bf16.msra.mxu0 %v1386_v59  ;;  %1411 = vmatpush.bf16.msra.mxu1 %v1386_v59  ;;  %v817_v63 = vld [vmem:[%s2098_s6 + $0x20] sm:$0xff]  ;;  %v818_v0 = vld [vmem:[%s2098_s6 + $0x28] sm:$0xff]  ;;  %v829_v31 = vpack.c.bf16 %v814_v62, %v813_v61  ;;  %v816_v41 = vld [vmem:[%s2098_s6 + $0x18] sm:$0xff] }
 0x267   :  { %v821_v22 = vld [vmem:[%s2098_s6 + $0x40] sm:$0xff]  ;;  %1412 = vmatpush.bf16.msra.mxu2 %v1386_v59  ;;  %1413 = vmatpush.bf16.msra.mxu3 %v1386_v59  ;;  %v822_v23 = vld [vmem:[%s2098_s6 + $0x48] sm:$0xff]  ;;  %v831_v32 = vpack.c.bf16 %v818_v0, %v817_v63  ;;  %v819_v48 = vld [vmem:[%s2098_s6 + $0x30] sm:$0xff]  ;;  %v830_v36 = vpack.c.bf16 %v816_v41, %v815_v40 }
 0x268   :  { %v825_v24 = vld [vmem:[%s2098_s6 + $0x60] sm:$0xff]  ;;  %v826_v25 = vld [vmem:[%s2098_s6 + $0x68] sm:$0xff]  ;;  %v833_v33 = vpack.c.bf16 %v822_v23, %v821_v22  ;;  %v820_v49 = vld [vmem:[%s2098_s6 + $0x38] sm:$0xff] }
 0x269   :  { %v835_v39 = vpack.c.bf16 %v826_v25, %v825_v24  ;;  %v823_v50 = vld [vmem:[%s2098_s6 + $0x50] sm:$0xff]  ;;  %v824_v51 = vld [vmem:[%s2098_s6 + $0x58] sm:$0xff]  ;;  %v832_v53 = vpack.c.bf16 %v820_v49, %v819_v48 }
 0x26a   :  { %912 = vmatpush.bf16.msra.mxu0 %v1385_v60  ;;  %1414 = vmatpush.bf16.msra.mxu1 %v1385_v60  ;;  %v827_v34 = vld [vmem:[%s2098_s6 + $0x70] sm:$0xff]  ;;  %v828_v35 = vld [vmem:[%s2098_s6 + $0x78] sm:$0xff]  ;;  %v834_v37 = vpack.c.bf16 %v824_v51, %v823_v50 }
 0x26b   :  { %1415 = vmatpush.bf16.msra.mxu2 %v1385_v60  ;;  %1416 = vmatpush.bf16.msra.mxu3 %v1385_v60  ;;  %v836_v38 = vpack.c.bf16 %v828_v35, %v827_v34 }
 0x26d   :  { %913 = vmatmul.bf16.vlgmr.msra.gmra.mxu0 %v829_v31  ;;  %923 = vmatmul.bf16.vlgmr.msra.gmra.mxu1 %v831_v32 }
 0x26e   :  { %933 = vmatmul.bf16.vlgmr.msra.gmra.mxu2 %v833_v33  ;;  %943 = vmatmul.bf16.vlgmr.msra.gmra.mxu3 %v835_v39 }
 0x27d   :  { %918 = vmatmul.bf16.gmra.mxu0 %v830_v36  ;;  %928 = vmatmul.bf16.gmra.mxu1 %v832_v53 }
 0x27e   :  { %938 = vmatmul.bf16.gmra.mxu2 %v834_v37  ;;  %948 = vmatmul.bf16.gmra.mxu3 %v836_v38 }
 0x2ea   :  { %v914_v43 = vpop.f32.mrf.mxu0  ;;  %v924_v44 = vpop.f32.mrf.mxu1 }
 0x2eb   :  { %v915_v45 = vadd.f32 %v1474_v42, %v914_v43  ;;  %v925_v46 = vadd.f32 %v1474_v42, %v924_v44 }
 0x2ed   :  { %954 = vst [vmem:[%s2098_s6] sm:$0xff] %v915_v45 }
 0x2ee   :  { %958 = vst [vmem:[%s2098_s6 + $0x20] sm:$0xff] %v925_v46 }
 0x2f1   :  { %v934_v54 = vpop.f32.mrf.mxu2  ;;  %v944_v55 = vpop.f32.mrf.mxu3 }
 0x2f2   :  { %v935_v52 = vadd.f32 %v1474_v42, %v934_v54  ;;  %v945_v57 = vadd.f32 %v1474_v42, %v944_v55  ;;  %v916_v1 = vpop.f32.mrf.mxu0  ;;  %v926_v5 = vpop.f32.mrf.mxu1 }
 0x2f3   :  { %v917_v2 = vadd.f32 %v1474_v42, %v916_v1  ;;  %v927_v3 = vadd.f32 %v1474_v42, %v926_v5 }
 0x2f4   :  { %962 = vst [vmem:[%s2098_s6 + $0x40] sm:$0xff] %v935_v52 }
 0x2f5   :  { %966 = vst [vmem:[%s2098_s6 + $0x60] sm:$0xff] %v945_v57 }
 0x2f6   :  { %955 = vst [vmem:[%s2098_s6 + $0x8] sm:$0xff] %v917_v2 }
 0x2f7   :  { %959 = vst [vmem:[%s2098_s6 + $0x28] sm:$0xff] %v927_v3 }
 0x2f9   :  { %v936_v4 = vpop.f32.mrf.mxu2  ;;  %v946_v6 = vpop.f32.mrf.mxu3 }
 0x2fa   :  { %v937_v7 = vadd.f32 %v1474_v42, %v936_v4  ;;  %v947_v8 = vadd.f32 %v1474_v42, %v946_v6  ;;  %v919_v9 = vpop.f32.mrf.mxu0  ;;  %v929_v10 = vpop.f32.mrf.mxu1 }
 0x2fb   :  { %v920_v11 = vadd.f32 %v1474_v42, %v919_v9  ;;  %v930_v12 = vadd.f32 %v1474_v42, %v929_v10 }
 0x2fc   :  { %963 = vst [vmem:[%s2098_s6 + $0x48] sm:$0xff] %v937_v7 }
 0x2fd   :  { %967 = vst [vmem:[%s2098_s6 + $0x68] sm:$0xff] %v947_v8 }
 0x2fe   :  { %956 = vst [vmem:[%s2098_s6 + $0x10] sm:$0xff] %v920_v11 }
 0x2ff   :  { %960 = vst [vmem:[%s2098_s6 + $0x30] sm:$0xff] %v930_v12 }
 0x301   :  { %v939_v13 = vpop.f32.mrf.mxu2  ;;  %v949_v14 = vpop.f32.mrf.mxu3 }
 0x302   :  { %v940_v15 = vadd.f32 %v1474_v42, %v939_v13  ;;  %v950_v16 = vadd.f32 %v1474_v42, %v949_v14  ;;  %v921_v17 = vpop.f32.mrf.mxu0  ;;  %v931_v18 = vpop.f32.mrf.mxu1 }
 0x303   :  { %v922_v19 = vadd.f32 %v1474_v42, %v921_v17  ;;  %v932_v20 = vadd.f32 %v1474_v42, %v931_v18 }
 0x304   :  { %964 = vst [vmem:[%s2098_s6 + $0x50] sm:$0xff] %v940_v15 }
 0x305   :  { %968 = vst [vmem:[%s2098_s6 + $0x70] sm:$0xff] %v950_v16 }
 0x306   :  { %957 = vst [vmem:[%s2098_s6 + $0x18] sm:$0xff] %v922_v19 }
 0x307   :  { %961 = vst [vmem:[%s2098_s6 + $0x38] sm:$0xff] %v932_v20 }
 0x309   :  { %v941_v21 = vpop.f32.mrf.mxu2  ;;  %v951_v26 = vpop.f32.mrf.mxu3 }
 0x30a   :  { %v942_v27 = vadd.f32 %v1474_v42, %v941_v21  ;;  %v952_v28 = vadd.f32 %v1474_v42, %v951_v26 }
 0x30c   :  { %965 = vst [vmem:[%s2098_s6 + $0x58] sm:$0xff] %v942_v27 }
 0x30d   :  { %969 = vst [vmem:[%s2098_s6 + $0x78] sm:$0xff] %v952_v28 }
 0x30e   :  { %974 = vsyncpa [#allocation6], 1 }
 0x30f   :  { %975 = vsyncpa [#allocation8], 1 }

</bundles_post_ra>
